<compile_context>
chip_gen: v7x
topology: tpu7x:2x2x1
jax: 0.10.0
libtpu: 0.0.40
codegen_flags: <defaults>
</compile_context>

<pallas_src>
import functools

import jax
import jax.numpy as jnp
from jax import lax
from jax.experimental import pallas as pl
from jax.experimental.pallas import tpu as pltpu


# ---------------------------------------------------------------------------
# In-kernel helper: 3x3 im2col with taps folded into the contraction dim.
# ---------------------------------------------------------------------------
def _im2col_9taps(xpad, nrows, W):
    """xpad: (nrows+2, W+2, C) -> (nrows*W, 9*C), column order (ky, kx, c).

    Matches w_hwio.reshape(9*C, Cout): row index = (ky*3 + kx)*C + c.
    Runs in the input dtype (bf16) -- taps are pure data movement.
    """
    cols = jnp.concatenate([xpad[:, dx:dx + W, :] for dx in range(3)], axis=2)
    taps = jnp.concatenate([cols[dy:dy + nrows] for dy in range(3)], axis=2)
    return taps.reshape(nrows * W, taps.shape[2])


# ---------------------------------------------------------------------------
# Kernel A: 3x3 conv + bias on a row tile, fused per-channel sum / sum-of-sq.
# ---------------------------------------------------------------------------
def _conv3x3_stats_kernel(xt_ref, w_ref, b_ref, y_ref, s1_ref, s2_ref):
    # xt_ref: (1, TH+2, W+2, Cin) bf16   zero-padded input tile (1-row halo)
    # w_ref:  (9*Cin, Cout)       bf16   taps folded into K (resident)
    # b_ref:  (1, Cout)           f32
    # y_ref:  (1, TH, W, Cout)    bf16
    # s1/s2:  (1, 1, Cout)        f32    accumulated across the H-tile axis
    TH, W, Cout = y_ref.shape[1], y_ref.shape[2], y_ref.shape[3]
    xp = xt_ref[0]                                        # bf16 tile
    xmat = _im2col_9taps(xp, TH, W)                       # (TH*W, 9*Cin) bf16
    y = jnp.dot(xmat, w_ref[...],
                preferred_element_type=jnp.float32) + b_ref[...]   # f32 epilogue
    y_ref[0] = y.reshape(TH, W, Cout).astype(y_ref.dtype)

    @pl.when(pl.program_id(1) == 0)
    def _init():
        s1_ref[...] = jnp.zeros_like(s1_ref)
        s2_ref[...] = jnp.zeros_like(s2_ref)

    s1_ref[...] += jnp.sum(y, axis=0, keepdims=True).reshape(s1_ref.shape)
    s2_ref[...] += jnp.sum(y * y, axis=0, keepdims=True).reshape(s2_ref.shape)


def conv3x3_with_stats(x_tiles, w_hwio, bias, n_h):
    NT, THp2, Wp2, Cin = x_tiles.shape
    N = NT // n_h
    TH, W = THp2 - 2, Wp2 - 2
    H = n_h * TH
    Cout = w_hwio.shape[-1]
    wk = w_hwio.reshape(9 * Cin, Cout).astype(jnp.bfloat16)
    b2 = bias.reshape(1, Cout).astype(jnp.float32)
    return pl.pallas_call(
        _conv3x3_stats_kernel,
        out_shape=(
            jax.ShapeDtypeStruct((N, H, W, Cout), jnp.bfloat16),
            jax.ShapeDtypeStruct((N, 1, Cout), jnp.float32),
            jax.ShapeDtypeStruct((N, 1, Cout), jnp.float32),
        ),
        grid=(N, n_h),
        in_specs=[
            pl.BlockSpec((1, THp2, Wp2, Cin), lambda n, h: (n * n_h + h, 0, 0, 0)),
            pl.BlockSpec((9 * Cin, Cout), lambda n, h: (0, 0)),
            pl.BlockSpec((1, Cout), lambda n, h: (0, 0)),
        ],
        out_specs=(
            pl.BlockSpec((1, TH, W, Cout), lambda n, h: (n, h, 0, 0)),
            pl.BlockSpec((1, 1, Cout), lambda n, h: (n, 0, 0)),
            pl.BlockSpec((1, 1, Cout), lambda n, h: (n, 0, 0)),
        ),
        compiler_params=pltpu.CompilerParams(
            dimension_semantics=("parallel", "arbitrary")),
    )(x_tiles, wk, b2)


# ---------------------------------------------------------------------------
# Kernel B: SwitchNorm affine + ReLU -> 3x3 conv + bias -> fused stats.
# ---------------------------------------------------------------------------
def _sn_relu_conv3x3_stats_kernel(yt_ref, sc_ref, sh_ref, w_ref, b_ref,
                                  o_ref, s1_ref, s2_ref):
    # yt_ref: (1, TH+2, W+2, Cmid) bf16   halo tile of the previous conv output
    # sc_ref, sh_ref: (1, 1, Cmid) f32    per-(n,c) SwitchNorm scale / shift
    # w_ref:  (9*Cmid, Cout)       bf16
    # b_ref:  (1, Cout)            f32
    # o_ref:  (1, TH, W, Cout)     bf16
    # s1/s2:  (1, 1, Cout)         f32
    TH, W, Cout = o_ref.shape[1], o_ref.shape[2], o_ref.shape[3]
    h = pl.program_id(1)
    H = TH * pl.num_programs(1)

    y = yt_ref[0].astype(jnp.float32)                     # (TH+2, W+2, Cmid)
    z = jnp.maximum(y * sc_ref[0] + sh_ref[0], 0.0)       # SN affine + ReLU (f32)
    # Zero the conv-padding ring: tile positions that fall outside the image
    # (the halo tile carries padded-image coordinates h*TH + row).
    rows = lax.broadcasted_iota(jnp.int32, z.shape, 0) + h * TH
    cols = lax.broadcasted_iota(jnp.int32, z.shape, 1)
    valid = (rows >= 1) & (rows <= H) & (cols >= 1) & (cols <= W)
    z = jnp.where(valid, z, 0.0).astype(jnp.bfloat16)

    xmat = _im2col_9taps(z, TH, W)                        # (TH*W, 9*Cmid) bf16
    yo = jnp.dot(xmat, w_ref[...],
                 preferred_element_type=jnp.float32) + b_ref[...]
    o_ref[0] = yo.reshape(TH, W, Cout).astype(o_ref.dtype)

    @pl.when(h == 0)
    def _init():
        s1_ref[...] = jnp.zeros_like(s1_ref)
        s2_ref[...] = jnp.zeros_like(s2_ref)

    s1_ref[...] += jnp.sum(yo, axis=0, keepdims=True).reshape(s1_ref.shape)
    s2_ref[...] += jnp.sum(yo * yo, axis=0, keepdims=True).reshape(s2_ref.shape)


def sn_relu_conv3x3_with_stats(y_tiles, scale, shift, w_hwio, bias, n_h):
    NT, THp2, Wp2, Cmid = y_tiles.shape
    N = NT // n_h
    TH, W = THp2 - 2, Wp2 - 2
    H = n_h * TH
    Cout = w_hwio.shape[-1]
    wk = w_hwio.reshape(9 * Cmid, Cout).astype(jnp.bfloat16)
    b2 = bias.reshape(1, Cout).astype(jnp.float32)
    return pl.pallas_call(
        _sn_relu_conv3x3_stats_kernel,
        out_shape=(
            jax.ShapeDtypeStruct((N, H, W, Cout), jnp.bfloat16),
            jax.ShapeDtypeStruct((N, 1, Cout), jnp.float32),
            jax.ShapeDtypeStruct((N, 1, Cout), jnp.float32),
        ),
        grid=(N, n_h),
        in_specs=[
            pl.BlockSpec((1, THp2, Wp2, Cmid), lambda n, h: (n * n_h + h, 0, 0, 0)),
            pl.BlockSpec((1, 1, Cmid), lambda n, h: (n, 0, 0)),
            pl.BlockSpec((1, 1, Cmid), lambda n, h: (n, 0, 0)),
            pl.BlockSpec((9 * Cmid, Cout), lambda n, h: (0, 0)),
            pl.BlockSpec((1, Cout), lambda n, h: (0, 0)),
        ],
        out_specs=(
            pl.BlockSpec((1, TH, W, Cout), lambda n, h: (n, h, 0, 0)),
            pl.BlockSpec((1, 1, Cout), lambda n, h: (n, 0, 0)),
            pl.BlockSpec((1, 1, Cout), lambda n, h: (n, 0, 0)),
        ),
        compiler_params=pltpu.CompilerParams(
            dimension_semantics=("parallel", "arbitrary")),
    )(y_tiles, scale, shift, wk, b2)


# ---------------------------------------------------------------------------
# Kernel C: final SwitchNorm affine + ReLU, lane-dense (TH, W*C) slabs.
# ---------------------------------------------------------------------------
def _sn_relu_kernel(y_ref, sc_ref, sh_ref, o_ref):
    # y_ref: (1, TH, W*C) bf16; sc/sh: (1, 1, W*C) f32; o_ref: (1, TH, W*C) f32
    o_ref[0] = jnp.maximum(y_ref[0].astype(jnp.float32) * sc_ref[0] + sh_ref[0], 0.0)


def sn_relu_apply(y_bf16, scale, shift, tile_h):
    N, H, W, C = y_bf16.shape
    # bf16 packs sublanes in pairs: keep the block sublane dim a multiple of 16
    # (or the full extent) so the load stays layout-friendly.
    th = tile_h if tile_h % 16 == 0 else H
    n_h = H // th
    yf = y_bf16.reshape(N, H, W * C)                    # free: row-major layout unchanged
    scf = jnp.tile(scale.astype(jnp.float32), (1, 1, W))   # (N, 1, W*C)
    shf = jnp.tile(shift.astype(jnp.float32), (1, 1, W))
    out = pl.pallas_call(
        _sn_relu_kernel,
        out_shape=jax.ShapeDtypeStruct((N, H, W * C), jnp.float32),
        grid=(N, n_h),
        in_specs=[
            pl.BlockSpec((1, th, W * C), lambda n, h: (n, h, 0)),
            pl.BlockSpec((1, 1, W * C), lambda n, h: (n, 0, 0)),
            pl.BlockSpec((1, 1, W * C), lambda n, h: (n, 0, 0)),
        ],
        out_specs=pl.BlockSpec((1, th, W * C), lambda n, h: (n, h, 0)),
        compiler_params=pltpu.CompilerParams(
            dimension_semantics=("parallel", "parallel")),
    )(yf, scf, shf)
    return out.reshape(N, H, W, C)


# ---------------------------------------------------------------------------
# Wrapper-side helpers: halo unfold and per-generation row-tile sizing.
# ---------------------------------------------------------------------------
def _pad_and_unfold(x_nhwc, tile_h):
    """(N, H, W, C) -> (N*n_h, TH+2, W+2, C) zero-padded, row-overlapping tiles.

    Tile (n, h) holds padded-image rows [h*TH, h*TH + TH + 2) -> a 1-row halo,
    so every conv BlockSpec is a standard non-overlapping block.
    """
    N, H, W, C = x_nhwc.shape
    n_h = H // tile_h
    xp = jnp.pad(x_nhwc, ((0, 0), (1, 1), (1, 1), (0, 0)))
    tiles = jnp.stack(
        [xp[:, h * tile_h:h * tile_h + tile_h + 2] for h in range(n_h)], axis=1)
    return tiles.reshape(N * n_h, tile_h + 2, W + 2, C)


def _choose_tile_h(H, W, cin, cout, vmem_budget_bytes=28 * 1024 * 1024):
    """Largest row tile TH dividing H whose per-grid-step footprint fits the budget.

    Budget sized for the smallest-VMEM generation (v7x: 64 MiB physical, 32 MiB
    default scoped); v5e/v6e (128 MiB) get the same safe choice.  Footprint ~
    2x bf16 in tile + 2x bf16 out tile (double buffered) + bf16 im2col operand
    + f32 matmul accumulator + resident weights.  Maximizing TH also maximizes
    the MXU M dim (TH*W), amortizing the ~0.35us per-grid-step overhead.
    """
    best = 1
    for th in range(1, H + 1):
        if H % th:
            continue
        fp = (2 * (th + 2) * (W + 2) * cin * 2
              + 2 * th * W * cout * 2
              + th * W * 9 * cin * 2
              + th * W * cout * 4
              + 9 * cin * cout * 2)
        if fp <= vmem_budget_bytes:
            best = th
    return best


# ---------------------------------------------------------------------------
# SwitchNorm2d statistic blending (tiny per-(N,C) math -> plain-JAX glue).
# ---------------------------------------------------------------------------
def switchnorm_scale_shift(s1, s2, hw, sn, eps=1e-5, training=True):
    """Per-(n, c) affine so that SwitchNorm2d(y) == y * scale + shift.

    s1, s2: (N, 1, C) per-image per-channel sum / sum-of-squares over H*W.
    TODO(synk): var via E[x^2]-E[x]^2 can cancel catastrophically for large
    means at deep/real UNet widths; switch to a shifted accumulation if needed.
    """
    s1 = s1[:, 0, :].astype(jnp.float32)
    s2 = s2[:, 0, :].astype(jnp.float32)
    hw = float(hw)
    mean_in = s1 / hw                                           # (N, C)
    # torch.Tensor.var defaults to the unbiased estimator (divide by HW-1).
    var_in = (s2 - hw * mean_in * mean_in) / (hw - 1.0)
    temp = var_in + mean_in * mean_in
    mean_ln = jnp.mean(mean_in, axis=1, keepdims=True)          # (N, 1)
    var_ln = jnp.mean(temp, axis=1, keepdims=True) - mean_ln * mean_ln
    if training:
        # TODO(synk): running_mean/running_var EMA buffer updates are a
        # training-time side effect and do not affect the returned tensor;
        # they are not reproduced here.
        mean_bn = jnp.mean(mean_in, axis=0, keepdims=True)      # (1, C)
        var_bn = jnp.mean(temp, axis=0, keepdims=True) - mean_bn * mean_bn
    else:
        mean_bn = sn["running_mean"][None, :]
        var_bn = sn["running_var"][None, :]
    mw = jax.nn.softmax(sn["mean_weight"])
    vw = jax.nn.softmax(sn["var_weight"])
    mean = mw[0] * mean_in + mw[1] * mean_ln + mw[2] * mean_bn  # (N, C)
    var = vw[0] * var_in + vw[1] * var_ln + vw[2] * var_bn
    scale = sn["gamma"][None, :] / jnp.sqrt(var + eps)
    shift = sn["beta"][None, :] - mean * scale
    return scale[:, None, :], shift[:, None, :]                 # (N, 1, C)


# ---------------------------------------------------------------------------
# Full forward: conv -> SN -> ReLU -> conv -> SN -> ReLU  (NCHW in/out).
# ---------------------------------------------------------------------------
@functools.partial(jax.jit, static_argnames=("training", "tile_h"))
def double_conv_sn_forward(x_nchw, params, training=True, tile_h=None, eps=1e-5):
    x = jnp.transpose(x_nchw, (0, 2, 3, 1)).astype(jnp.float32)   # NCHW -> NHWC
    N, H, W, Cin = x.shape
    Cmid = params["w1"].shape[-1]
    Cout = params["w2"].shape[-1]
    if tile_h is None:
        tile_h = _choose_tile_h(H, W, max(Cin, Cmid), max(Cmid, Cout))
    assert H % tile_h == 0, (H, tile_h)
    n_h = H // tile_h
    hw = H * W

    x_tiles = _pad_and_unfold(x.astype(jnp.bfloat16), tile_h)
    y1, a1, q1 = conv3x3_with_stats(x_tiles, params["w1"], params["b1"], n_h)
    sc1, sh1 = switchnorm_scale_shift(a1, q1, hw, params["sn1"], eps, training)

    y1_tiles = _pad_and_unfold(y1, tile_h)      # bf16 halo tiles of conv1 output
    y2, a2, q2 = sn_relu_conv3x3_with_stats(y1_tiles, sc1, sh1,
                                            params["w2"], params["b2"], n_h)
    sc2, sh2 = switchnorm_scale_shift(a2, q2, hw, params["sn2"], eps, training)

    out = sn_relu_apply(y2, sc2, sh2, tile_h)
    return jnp.transpose(out, (0, 3, 1, 2))                        # NHWC -> NCHW


# ---------------------------------------------------------------------------
# Pure-JAX reference (correctness check only) — bf16 conv operands, f32 acc,
# direct transcription of SwitchNorm2d.forward.
# ---------------------------------------------------------------------------
def _conv3x3_ref(x_nhwc, w_hwio, bias):
    y = jax.lax.conv_general_dilated(
        x_nhwc.astype(jnp.bfloat16), w_hwio.astype(jnp.bfloat16),
        window_strides=(1, 1), padding="SAME",
        dimension_numbers=("NHWC", "HWIO", "NHWC"),
        preferred_element_type=jnp.float32)
    return y + bias.reshape(1, 1, 1, -1).astype(jnp.float32)


def _switchnorm_ref(y, sn, eps=1e-5, training=True):
    mean_in = jnp.mean(y, axis=(1, 2), keepdims=True)                 # (N,1,1,C)
    var_in = jnp.var(y, axis=(1, 2), keepdims=True, ddof=1)           # unbiased
    temp = var_in + mean_in ** 2
    mean_ln = jnp.mean(mean_in, axis=3, keepdims=True)                # (N,1,1,1)
    var_ln = jnp.mean(temp, axis=3, keepdims=True) - mean_ln ** 2
    if training:
        mean_bn = jnp.mean(mean_in, axis=0, keepdims=True)            # (1,1,1,C)
        var_bn = jnp.mean(temp, axis=0, keepdims=True) - mean_bn ** 2
    else:
        mean_bn = sn["running_mean"].reshape(1, 1, 1, -1)
        var_bn = sn["running_var"].reshape(1, 1, 1, -1)
    mw = jax.nn.softmax(sn["mean_weight"])
    vw = jax.nn.softmax(sn["var_weight"])
    mean = mw[0] * mean_in + mw[1] * mean_ln + mw[2] * mean_bn
    var = vw[0] * var_in + vw[1] * var_ln + vw[2] * var_bn
    yn = (y - mean) / jnp.sqrt(var + eps)
    return yn * sn["gamma"].reshape(1, 1, 1, -1) + sn["beta"].reshape(1, 1, 1, -1)


@functools.partial(jax.jit, static_argnames=("training",))
def double_conv_sn_reference(x_nchw, params, training=True, eps=1e-5):
    x = jnp.transpose(x_nchw, (0, 2, 3, 1)).astype(jnp.float32)
    y1 = _conv3x3_ref(x, params["w1"], params["b1"])
    z1 = jnp.maximum(_switchnorm_ref(y1, params["sn1"], eps, training), 0.0)
    y2 = _conv3x3_ref(z1, params["w2"], params["b2"])
    z2 = jnp.maximum(_switchnorm_ref(y2, params["sn2"], eps, training), 0.0)
    return jnp.transpose(z2, (0, 3, 1, 2))


# ---------------------------------------------------------------------------
# Parameter setup (glue).  PyTorch defaults would be gamma=1, beta=0, uniform
# softmax weights and zero running buffers (SwitchNorm2d zeroes running_var);
# we perturb slightly so the check is non-trivial.
# ---------------------------------------------------------------------------
def init_double_conv_sn_params(key, in_channels, out_channels, mid_channels=None):
    if mid_channels is None:
        mid_channels = out_channels
    ks = jax.random.split(key, 12)

    def sn_init(kg, kb, kmw, kvw, c):
        return {
            "gamma": 1.0 + 0.1 * jax.random.normal(kg, (c,), jnp.float32),
            "beta": 0.05 * jax.random.normal(kb, (c,), jnp.float32),
            "mean_weight": 1.0 + 0.2 * jax.random.normal(kmw, (3,), jnp.float32),
            "var_weight": 1.0 + 0.2 * jax.random.normal(kvw, (3,), jnp.float32),
            "running_mean": jnp.zeros((c,), jnp.float32),
            "running_var": jnp.zeros((c,), jnp.float32),
        }

    return {
        "w1": jax.random.normal(ks[0], (3, 3, in_channels, mid_channels), jnp.float32)
              * (2.0 / (9 * in_channels)) ** 0.5,
        "b1": 0.05 * jax.random.normal(ks[1], (mid_channels,), jnp.float32),
        "w2": jax.random.normal(ks[2], (3, 3, mid_channels, out_channels), jnp.float32)
              * (2.0 / (9 * mid_channels)) ** 0.5,
        "b2": 0.05 * jax.random.normal(ks[3], (out_channels,), jnp.float32),
        "sn1": sn_init(ks[4], ks[5], ks[6], ks[7], mid_channels),
        "sn2": sn_init(ks[8], ks[9], ks[10], ks[11], out_channels),
    }


if __name__ == "__main__":
    in_channels, out_channels = 4, 8
    key = jax.random.PRNGKey(0)
    kp, kx = jax.random.split(key)
    params = init_double_conv_sn_params(kp, in_channels, out_channels)
    x = jax.random.normal(kx, (2, in_channels, 16, 16), jnp.float32)  # NCHW like PyTorch

    # Training-mode forward (PyTorch default for a fresh module).  tile_h=8 forces
    # 2 row tiles so the halo path and cross-tile stat accumulation are exercised.
    out = jax.block_until_ready(double_conv_sn_forward(x, params, training=True, tile_h=8))
    assert out.shape == (2, out_channels, 16, 16), out.shape
    ref = jax.block_until_ready(double_conv_sn_reference(x, params, training=True))
    err = float(jnp.max(jnp.abs(out - ref)))
    # bf16 inter-kernel activations add ~1e-2 of rounding vs the f32 reference.
    assert jnp.allclose(out, ref, atol=3e-2, rtol=3e-2), err

    # Eval-mode branch (running statistics) with the VMEM-budget tile heuristic.
    out_e = jax.block_until_ready(double_conv_sn_forward(x, params, training=False))
    ref_e = jax.block_until_ready(double_conv_sn_reference(x, params, training=False))
    err_e = float(jnp.max(jnp.abs(out_e - ref_e)))
    assert jnp.allclose(out_e, ref_e, atol=3e-2, rtol=3e-2), err_e

    print("KERNEL_OK")
</pallas_src>

<mosaic_0001>
module attributes {stable_mosaic.version = 11 : i64} {
  func.func @_conv3x3_stats_kernel(%arg0: i32, %arg1: i32, %arg2: memref<1x10x18x4xbf16, #tpu.memory_space<vmem>>, %arg3: memref<36x8xbf16, #tpu.memory_space<vmem>>, %arg4: memref<1x8xf32, #tpu.memory_space<vmem>>, %arg5: memref<1x8x16x8xbf16, #tpu.memory_space<vmem>>, %arg6: memref<1x1x8xf32, #tpu.memory_space<vmem>>, %arg7: memref<1x1x8xf32, #tpu.memory_space<vmem>>) attributes {dimension_semantics = [#tpu.dimension_semantics<parallel>, #tpu.dimension_semantics<arbitrary>], iteration_bounds = array<i64: 2, 2>, scalar_prefetch = 0 : i64, scratch_operands = 0 : i64, tpu.core_type = #tpu.core_type<tc>, window_params = [{transform_indices = @transform_0, window_bounds = array<i64: 1, 10, 18, 4>}, {pipeline_mode = #tpu.pipeline_mode<synchronous>, transform_indices = @transform_1, window_bounds = array<i64: 36, 8>}, {pipeline_mode = #tpu.pipeline_mode<synchronous>, transform_indices = @transform_2, window_bounds = array<i64: 1, 8>}, {transform_indices = @transform_3, window_bounds = array<i64: 1, 8, 16, 8>}, {transform_indices = @transform_4, window_bounds = array<i64: 1, 1, 8>}, {transform_indices = @transform_5, window_bounds = array<i64: 1, 1, 8>}]} {
    %c0 = arith.constant 0 : index
    %c0_0 = arith.constant 0 : index
    %c0_1 = arith.constant 0 : index
    %c0_2 = arith.constant 0 : index
    %0 = vector.load %arg2[%c0, %c0_0, %c0_1, %c0_2] : memref<1x10x18x4xbf16, #tpu.memory_space<vmem>>, vector<1x10x18x4xbf16>
    %1 = vector.shape_cast %0 : vector<1x10x18x4xbf16> to vector<10x18x4xbf16>
    %2 = vector.extract_strided_slice %1 {offsets = [0, 0, 0], sizes = [10, 16, 4], strides = [1, 1, 1]} : vector<10x18x4xbf16> to vector<10x16x4xbf16>
    %3 = vector.extract_strided_slice %1 {offsets = [0, 1, 0], sizes = [10, 16, 4], strides = [1, 1, 1]} : vector<10x18x4xbf16> to vector<10x16x4xbf16>
    %4 = vector.extract_strided_slice %1 {offsets = [0, 2, 0], sizes = [10, 16, 4], strides = [1, 1, 1]} : vector<10x18x4xbf16> to vector<10x16x4xbf16>
    %5 = tpu.concatenate %2, %3, %4 in 2 : vector<10x16x4xbf16>, vector<10x16x4xbf16>, vector<10x16x4xbf16> -> vector<10x16x12xbf16>
    %6 = vector.extract_strided_slice %5 {offsets = [0, 0, 0], sizes = [8, 16, 12], strides = [1, 1, 1]} : vector<10x16x12xbf16> to vector<8x16x12xbf16>
    %7 = vector.extract_strided_slice %5 {offsets = [1, 0, 0], sizes = [8, 16, 12], strides = [1, 1, 1]} : vector<10x16x12xbf16> to vector<8x16x12xbf16>
    %8 = vector.extract_strided_slice %5 {offsets = [2, 0, 0], sizes = [8, 16, 12], strides = [1, 1, 1]} : vector<10x16x12xbf16> to vector<8x16x12xbf16>
    %9 = tpu.concatenate %6, %7, %8 in 2 : vector<8x16x12xbf16>, vector<8x16x12xbf16>, vector<8x16x12xbf16> -> vector<8x16x36xbf16>
    %10 = vector.shape_cast %9 : vector<8x16x36xbf16> to vector<128x36xbf16>
    %c0_3 = arith.constant 0 : index
    %c0_4 = arith.constant 0 : index
    %11 = vector.load %arg3[%c0_3, %c0_4] : memref<36x8xbf16, #tpu.memory_space<vmem>>, vector<36x8xbf16>
    %cst = arith.constant dense<0.000000e+00> : vector<128x8xf32>
    %12 = tpu.matmul %10, %11, %cst {dimension_numbers = #tpu.dot_dimension_numbers<[1], [0], [0], [1], [0, 0, 1, 1], [], []>} : vector<128x36xbf16>, vector<36x8xbf16>, vector<128x8xf32> -> vector<128x8xf32>
    %c0_5 = arith.constant 0 : index
    %c0_6 = arith.constant 0 : index
    %13 = vector.load %arg4[%c0_5, %c0_6] : memref<1x8xf32, #tpu.memory_space<vmem>>, vector<1x8xf32>
    %14 = vector.broadcast %13 : vector<1x8xf32> to vector<128x8xf32>
    %15 = arith.addf %12, %14 : vector<128x8xf32>
    %16 = vector.shape_cast %15 : vector<128x8xf32> to vector<8x16x8xf32>
    %17 = arith.truncf %16 : vector<8x16x8xf32> to vector<8x16x8xbf16>
    %c0_7 = arith.constant 0 : index
    %c0_8 = arith.constant 0 : index
    %c0_9 = arith.constant 0 : index
    %c0_10 = arith.constant 0 : index
    %18 = vector.load %arg5[%c0_7, %c0_8, %c0_9, %c0_10] : memref<1x8x16x8xbf16, #tpu.memory_space<vmem>>, vector<1x8x16x8xbf16>
    %19 = vector.shape_cast %18 : vector<1x8x16x8xbf16> to vector<8x16x8xbf16>
    %20 = vector.shape_cast %17 : vector<8x16x8xbf16> to vector<1x8x16x8xbf16>
    tpu.vector_store %arg5[%c0_7, %c0_8, %c0_9, %c0_10], %20 {strides = array<i32>} : memref<1x8x16x8xbf16, #tpu.memory_space<vmem>>, vector<1x8x16x8xbf16>,
    %c0_i32 = arith.constant 0 : i32
    %21 = arith.cmpi eq, %arg1, %c0_i32 : i32
    %22 = arith.extui %21 : i1 to i32
    %c0_i32_11 = arith.constant 0 : i32
    %23 = arith.cmpi ne, %22, %c0_i32_11 : i32
    scf.if %23 {
      %cst_26 = arith.constant 0.000000e+00 : f32
      %37 = vector.broadcast %cst_26 : f32 to vector<1x1x8xf32>
      %c0_27 = arith.constant 0 : index
      %c0_28 = arith.constant 0 : index
      %c0_29 = arith.constant 0 : index
      %38 = vector.load %arg6[%c0_27, %c0_28, %c0_29] : memref<1x1x8xf32, #tpu.memory_space<vmem>>, vector<1x1x8xf32>
      tpu.vector_store %arg6[%c0_27, %c0_28, %c0_29], %37 {strides = array<i32>} : memref<1x1x8xf32, #tpu.memory_space<vmem>>, vector<1x1x8xf32>,
      %cst_30 = arith.constant 0.000000e+00 : f32
      %39 = vector.broadcast %cst_30 : f32 to vector<1x1x8xf32>
      %c0_31 = arith.constant 0 : index
      %c0_32 = arith.constant 0 : index
      %c0_33 = arith.constant 0 : index
      %40 = vector.load %arg7[%c0_31, %c0_32, %c0_33] : memref<1x1x8xf32, #tpu.memory_space<vmem>>, vector<1x1x8xf32>
      tpu.vector_store %arg7[%c0_31, %c0_32, %c0_33], %39 {strides = array<i32>} : memref<1x1x8xf32, #tpu.memory_space<vmem>>, vector<1x1x8xf32>,
    } else {
    }
    %c0_12 = arith.constant 0 : index
    %c0_13 = arith.constant 0 : index
    %c0_14 = arith.constant 0 : index
    %24 = vector.load %arg6[%c0_12, %c0_13, %c0_14] : memref<1x1x8xf32, #tpu.memory_space<vmem>>, vector<1x1x8xf32>
    %cst_15 = arith.constant dense<0.000000e+00> : vector<8xf32>
    %25 = vector.multi_reduction <add>, %15, %cst_15 [0] : vector<128x8xf32> to vector<8xf32>
    %26 = vector.shape_cast %25 : vector<8xf32> to vector<1x8xf32>
    %27 = vector.shape_cast %26 : vector<1x8xf32> to vector<1x1x8xf32>
    %28 = arith.addf %24, %27 : vector<1x1x8xf32>
    %c0_16 = arith.constant 0 : index
    %c0_17 = arith.constant 0 : index
    %c0_18 = arith.constant 0 : index
    %29 = vector.load %arg6[%c0_16, %c0_17, %c0_18] : memref<1x1x8xf32, #tpu.memory_space<vmem>>, vector<1x1x8xf32>
    tpu.vector_store %arg6[%c0_16, %c0_17, %c0_18], %28 {strides = array<i32>} : memref<1x1x8xf32, #tpu.memory_space<vmem>>, vector<1x1x8xf32>,
    %c0_19 = arith.constant 0 : index
    %c0_20 = arith.constant 0 : index
    %c0_21 = arith.constant 0 : index
    %30 = vector.load %arg7[%c0_19, %c0_20, %c0_21] : memref<1x1x8xf32, #tpu.memory_space<vmem>>, vector<1x1x8xf32>
    %31 = arith.mulf %15, %15 : vector<128x8xf32>
    %cst_22 = arith.constant dense<0.000000e+00> : vector<8xf32>
    %32 = vector.multi_reduction <add>, %31, %cst_22 [0] : vector<128x8xf32> to vector<8xf32>
    %33 = vector.shape_cast %32 : vector<8xf32> to vector<1x8xf32>
    %34 = vector.shape_cast %33 : vector<1x8xf32> to vector<1x1x8xf32>
    %35 = arith.addf %30, %34 : vector<1x1x8xf32>
    %c0_23 = arith.constant 0 : index
    %c0_24 = arith.constant 0 : index
    %c0_25 = arith.constant 0 : index
    %36 = vector.load %arg7[%c0_23, %c0_24, %c0_25] : memref<1x1x8xf32, #tpu.memory_space<vmem>>, vector<1x1x8xf32>
    tpu.vector_store %arg7[%c0_23, %c0_24, %c0_25], %35 {strides = array<i32>} : memref<1x1x8xf32, #tpu.memory_space<vmem>>, vector<1x1x8xf32>,
    return
  }
  func.func @transform_0(%arg0: i32, %arg1: i32) -> (i32, i32, i32, i32) {
    %c2_i32 = arith.constant 2 : i32
    %0 = arith.muli %arg0, %c2_i32 : i32
    %1 = arith.addi %0, %arg1 : i32
    %c0_i32 = arith.constant 0 : i32
    %c0_i32_0 = arith.constant 0 : i32
    %c0_i32_1 = arith.constant 0 : i32
    %c0_i32_2 = arith.constant 0 : i32
    return %1, %c0_i32, %c0_i32_0, %c0_i32_1 : i32, i32, i32, i32
  }
  func.func @transform_1(%arg0: i32, %arg1: i32) -> (i32, i32) {
    %c0_i32 = arith.constant 0 : i32
    %c0_i32_0 = arith.constant 0 : i32
    %c0_i32_1 = arith.constant 0 : i32
    return %c0_i32, %c0_i32_0 : i32, i32
  }
  func.func @transform_2(%arg0: i32, %arg1: i32) -> (i32, i32) {
    %c0_i32 = arith.constant 0 : i32
    %c0_i32_0 = arith.constant 0 : i32
    %c0_i32_1 = arith.constant 0 : i32
    return %c0_i32, %c0_i32_0 : i32, i32
  }
  func.func @transform_3(%arg0: i32, %arg1: i32) -> (i32, i32, i32, i32) {
    %c0_i32 = arith.constant 0 : i32
    %c0_i32_0 = arith.constant 0 : i32
    %c0_i32_1 = arith.constant 0 : i32
    return %arg0, %arg1, %c0_i32, %c0_i32_0 : i32, i32, i32, i32
  }
  func.func @transform_4(%arg0: i32, %arg1: i32) -> (i32, i32, i32) {
    %c0_i32 = arith.constant 0 : i32
    %c0_i32_0 = arith.constant 0 : i32
    %c0_i32_1 = arith.constant 0 : i32
    return %arg0, %c0_i32, %c0_i32_0 : i32, i32, i32
  }
  func.func @transform_5(%arg0: i32, %arg1: i32) -> (i32, i32, i32) {
    %c0_i32 = arith.constant 0 : i32
    %c0_i32_0 = arith.constant 0 : i32
    %c0_i32_1 = arith.constant 0 : i32
    return %arg0, %c0_i32, %c0_i32_0 : i32, i32, i32
  }
}

module attributes {stable_mosaic.version = 11 : i64} {
  func.func @_sn_relu_conv3x3_stats_kernel(%arg0: i32, %arg1: i32, %arg2: memref<1x10x18x8xbf16, #tpu.memory_space<vmem>>, %arg3: memref<1x1x8xf32, #tpu.memory_space<vmem>>, %arg4: memref<1x1x8xf32, #tpu.memory_space<vmem>>, %arg5: memref<72x8xbf16, #tpu.memory_space<vmem>>, %arg6: memref<1x8xf32, #tpu.memory_space<vmem>>, %arg7: memref<1x8x16x8xbf16, #tpu.memory_space<vmem>>, %arg8: memref<1x1x8xf32, #tpu.memory_space<vmem>>, %arg9: memref<1x1x8xf32, #tpu.memory_space<vmem>>) attributes {dimension_semantics = [#tpu.dimension_semantics<parallel>, #tpu.dimension_semantics<arbitrary>], iteration_bounds = array<i64: 2, 2>, scalar_prefetch = 0 : i64, scratch_operands = 0 : i64, tpu.core_type = #tpu.core_type<tc>, window_params = [{transform_indices = @transform_0, window_bounds = array<i64: 1, 10, 18, 8>}, {transform_indices = @transform_1, window_bounds = array<i64: 1, 1, 8>}, {transform_indices = @transform_2, window_bounds = array<i64: 1, 1, 8>}, {pipeline_mode = #tpu.pipeline_mode<synchronous>, transform_indices = @transform_3, window_bounds = array<i64: 72, 8>}, {pipeline_mode = #tpu.pipeline_mode<synchronous>, transform_indices = @transform_4, window_bounds = array<i64: 1, 8>}, {transform_indices = @transform_5, window_bounds = array<i64: 1, 8, 16, 8>}, {transform_indices = @transform_6, window_bounds = array<i64: 1, 1, 8>}, {transform_indices = @transform_7, window_bounds = array<i64: 1, 1, 8>}]} {
    %c0 = arith.constant 0 : index
    %c0_0 = arith.constant 0 : index
    %c0_1 = arith.constant 0 : index
    %c0_2 = arith.constant 0 : index
    %0 = vector.load %arg2[%c0, %c0_0, %c0_1, %c0_2] : memref<1x10x18x8xbf16, #tpu.memory_space<vmem>>, vector<1x10x18x8xbf16>
    %1 = vector.shape_cast %0 : vector<1x10x18x8xbf16> to vector<10x18x8xbf16>
    %2 = arith.extf %1 : vector<10x18x8xbf16> to vector<10x18x8xf32>
    %c0_3 = arith.constant 0 : index
    %c0_4 = arith.constant 0 : index
    %c0_5 = arith.constant 0 : index
    %3 = vector.load %arg3[%c0_3, %c0_4, %c0_5] : memref<1x1x8xf32, #tpu.memory_space<vmem>>, vector<1x1x8xf32>
    %4 = vector.shape_cast %3 : vector<1x1x8xf32> to vector<1x8xf32>
    %5 = vector.shape_cast %4 : vector<1x8xf32> to vector<1x1x8xf32>
    %6 = vector.broadcast %5 : vector<1x1x8xf32> to vector<10x18x8xf32>
    %7 = arith.mulf %2, %6 : vector<10x18x8xf32>
    %c0_6 = arith.constant 0 : index
    %c0_7 = arith.constant 0 : index
    %c0_8 = arith.constant 0 : index
    %8 = vector.load %arg4[%c0_6, %c0_7, %c0_8] : memref<1x1x8xf32, #tpu.memory_space<vmem>>, vector<1x1x8xf32>
    %9 = vector.shape_cast %8 : vector<1x1x8xf32> to vector<1x8xf32>
    %10 = vector.shape_cast %9 : vector<1x8xf32> to vector<1x1x8xf32>
    %11 = vector.broadcast %10 : vector<1x1x8xf32> to vector<10x18x8xf32>
    %12 = arith.addf %7, %11 : vector<10x18x8xf32>
    %cst = arith.constant 0.000000e+00 : f32
    %13 = vector.broadcast %cst : f32 to vector<10x18x8xf32>
    %14 = arith.maximumf %12, %13 : vector<10x18x8xf32>
    %15 = tpu.iota {dimensions = array<i32: 0>} : vector<10x18x8xi32>
    %c8_i32 = arith.constant 8 : i32
    %16 = arith.muli %arg1, %c8_i32 : i32
    %17 = vector.broadcast %16 : i32 to vector<10x18x8xi32>
    %18 = arith.addi %15, %17 : vector<10x18x8xi32>
    %19 = tpu.iota {dimensions = array<i32: 1>} : vector<10x18x8xi32>
    %c1_i32 = arith.constant 1 : i32
    %20 = vector.broadcast %c1_i32 : i32 to vector<10x18x8xi32>
    %21 = arith.cmpi sge, %18, %20 : vector<10x18x8xi32>
    %c16_i32 = arith.constant 16 : i32
    %22 = vector.broadcast %c16_i32 : i32 to vector<10x18x8xi32>
    %23 = arith.cmpi sle, %18, %22 : vector<10x18x8xi32>
    %24 = arith.andi %21, %23 : vector<10x18x8xi1>
    %c1_i32_9 = arith.constant 1 : i32
    %25 = vector.broadcast %c1_i32_9 : i32 to vector<10x18x8xi32>
    %26 = arith.cmpi sge, %19, %25 : vector<10x18x8xi32>
    %27 = arith.andi %24, %26 : vector<10x18x8xi1>
    %c16_i32_10 = arith.constant 16 : i32
    %28 = vector.broadcast %c16_i32_10 : i32 to vector<10x18x8xi32>
    %29 = arith.cmpi sle, %19, %28 : vector<10x18x8xi32>
    %30 = arith.andi %27, %29 : vector<10x18x8xi1>
    %cst_11 = arith.constant 0.000000e+00 : f32
    %31 = vector.broadcast %cst_11 : f32 to vector<10x18x8xf32>
    %32 = arith.select %30, %14, %31 : vector<10x18x8xi1>, vector<10x18x8xf32>
    %33 = arith.truncf %32 : vector<10x18x8xf32> to vector<10x18x8xbf16>
    %34 = vector.extract_strided_slice %33 {offsets = [0, 0, 0], sizes = [10, 16, 8], strides = [1, 1, 1]} : vector<10x18x8xbf16> to vector<10x16x8xbf16>
    %35 = vector.extract_strided_slice %33 {offsets = [0, 1, 0], sizes = [10, 16, 8], strides = [1, 1, 1]} : vector<10x18x8xbf16> to vector<10x16x8xbf16>
    %36 = vector.extract_strided_slice %33 {offsets = [0, 2, 0], sizes = [10, 16, 8], strides = [1, 1, 1]} : vector<10x18x8xbf16> to vector<10x16x8xbf16>
    %37 = tpu.concatenate %34, %35, %36 in 2 : vector<10x16x8xbf16>, vector<10x16x8xbf16>, vector<10x16x8xbf16> -> vector<10x16x24xbf16>
    %38 = vector.extract_strided_slice %37 {offsets = [0, 0, 0], sizes = [8, 16, 24], strides = [1, 1, 1]} : vector<10x16x24xbf16> to vector<8x16x24xbf16>
    %39 = vector.extract_strided_slice %37 {offsets = [1, 0, 0], sizes = [8, 16, 24], strides = [1, 1, 1]} : vector<10x16x24xbf16> to vector<8x16x24xbf16>
    %40 = vector.extract_strided_slice %37 {offsets = [2, 0, 0], sizes = [8, 16, 24], strides = [1, 1, 1]} : vector<10x16x24xbf16> to vector<8x16x24xbf16>
    %41 = tpu.concatenate %38, %39, %40 in 2 : vector<8x16x24xbf16>, vector<8x16x24xbf16>, vector<8x16x24xbf16> -> vector<8x16x72xbf16>
    %42 = vector.shape_cast %41 : vector<8x16x72xbf16> to vector<128x72xbf16>
    %c0_12 = arith.constant 0 : index
    %c0_13 = arith.constant 0 : index
    %43 = vector.load %arg5[%c0_12, %c0_13] : memref<72x8xbf16, #tpu.memory_space<vmem>>, vector<72x8xbf16>
    %cst_14 = arith.constant dense<0.000000e+00> : vector<128x8xf32>
    %44 = tpu.matmul %42, %43, %cst_14 {dimension_numbers = #tpu.dot_dimension_numbers<[1], [0], [0], [1], [0, 0, 1, 1], [], []>} : vector<128x72xbf16>, vector<72x8xbf16>, vector<128x8xf32> -> vector<128x8xf32>
    %c0_15 = arith.constant 0 : index
    %c0_16 = arith.constant 0 : index
    %45 = vector.load %arg6[%c0_15, %c0_16] : memref<1x8xf32, #tpu.memory_space<vmem>>, vector<1x8xf32>
    %46 = vector.broadcast %45 : vector<1x8xf32> to vector<128x8xf32>
    %47 = arith.addf %44, %46 : vector<128x8xf32>
    %48 = vector.shape_cast %47 : vector<128x8xf32> to vector<8x16x8xf32>
    %49 = arith.truncf %48 : vector<8x16x8xf32> to vector<8x16x8xbf16>
    %c0_17 = arith.constant 0 : index
    %c0_18 = arith.constant 0 : index
    %c0_19 = arith.constant 0 : index
    %c0_20 = arith.constant 0 : index
    %50 = vector.load %arg7[%c0_17, %c0_18, %c0_19, %c0_20] : memref<1x8x16x8xbf16, #tpu.memory_space<vmem>>, vector<1x8x16x8xbf16>
    %51 = vector.shape_cast %50 : vector<1x8x16x8xbf16> to vector<8x16x8xbf16>
    %52 = vector.shape_cast %49 : vector<8x16x8xbf16> to vector<1x8x16x8xbf16>
    tpu.vector_store %arg7[%c0_17, %c0_18, %c0_19, %c0_20], %52 {strides = array<i32>} : memref<1x8x16x8xbf16, #tpu.memory_space<vmem>>, vector<1x8x16x8xbf16>,
    %c0_i32 = arith.constant 0 : i32
    %53 = arith.cmpi eq, %arg1, %c0_i32 : i32
    %54 = arith.extui %53 : i1 to i32
    %c0_i32_21 = arith.constant 0 : i32
    %55 = arith.cmpi ne, %54, %c0_i32_21 : i32
    scf.if %55 {
      %cst_36 = arith.constant 0.000000e+00 : f32
      %69 = vector.broadcast %cst_36 : f32 to vector<1x1x8xf32>
      %c0_37 = arith.constant 0 : index
      %c0_38 = arith.constant 0 : index
      %c0_39 = arith.constant 0 : index
      %70 = vector.load %arg8[%c0_37, %c0_38, %c0_39] : memref<1x1x8xf32, #tpu.memory_space<vmem>>, vector<1x1x8xf32>
      tpu.vector_store %arg8[%c0_37, %c0_38, %c0_39], %69 {strides = array<i32>} : memref<1x1x8xf32, #tpu.memory_space<vmem>>, vector<1x1x8xf32>,
      %cst_40 = arith.constant 0.000000e+00 : f32
      %71 = vector.broadcast %cst_40 : f32 to vector<1x1x8xf32>
      %c0_41 = arith.constant 0 : index
      %c0_42 = arith.constant 0 : index
      %c0_43 = arith.constant 0 : index
      %72 = vector.load %arg9[%c0_41, %c0_42, %c0_43] : memref<1x1x8xf32, #tpu.memory_space<vmem>>, vector<1x1x8xf32>
      tpu.vector_store %arg9[%c0_41, %c0_42, %c0_43], %71 {strides = array<i32>} : memref<1x1x8xf32, #tpu.memory_space<vmem>>, vector<1x1x8xf32>,
    } else {
    }
    %c0_22 = arith.constant 0 : index
    %c0_23 = arith.constant 0 : index
    %c0_24 = arith.constant 0 : index
    %56 = vector.load %arg8[%c0_22, %c0_23, %c0_24] : memref<1x1x8xf32, #tpu.memory_space<vmem>>, vector<1x1x8xf32>
    %cst_25 = arith.constant dense<0.000000e+00> : vector<8xf32>
    %57 = vector.multi_reduction <add>, %47, %cst_25 [0] : vector<128x8xf32> to vector<8xf32>
    %58 = vector.shape_cast %57 : vector<8xf32> to vector<1x8xf32>
    %59 = vector.shape_cast %58 : vector<1x8xf32> to vector<1x1x8xf32>
    %60 = arith.addf %56, %59 : vector<1x1x8xf32>
    %c0_26 = arith.constant 0 : index
    %c0_27 = arith.constant 0 : index
    %c0_28 = arith.constant 0 : index
    %61 = vector.load %arg8[%c0_26, %c0_27, %c0_28] : memref<1x1x8xf32, #tpu.memory_space<vmem>>, vector<1x1x8xf32>
    tpu.vector_store %arg8[%c0_26, %c0_27, %c0_28], %60 {strides = array<i32>} : memref<1x1x8xf32, #tpu.memory_space<vmem>>, vector<1x1x8xf32>,
    %c0_29 = arith.constant 0 : index
    %c0_30 = arith.constant 0 : index
    %c0_31 = arith.constant 0 : index
    %62 = vector.load %arg9[%c0_29, %c0_30, %c0_31] : memref<1x1x8xf32, #tpu.memory_space<vmem>>, vector<1x1x8xf32>
    %63 = arith.mulf %47, %47 : vector<128x8xf32>
    %cst_32 = arith.constant dense<0.000000e+00> : vector<8xf32>
    %64 = vector.multi_reduction <add>, %63, %cst_32 [0] : vector<128x8xf32> to vector<8xf32>
    %65 = vector.shape_cast %64 : vector<8xf32> to vector<1x8xf32>
    %66 = vector.shape_cast %65 : vector<1x8xf32> to vector<1x1x8xf32>
    %67 = arith.addf %62, %66 : vector<1x1x8xf32>
    %c0_33 = arith.constant 0 : index
    %c0_34 = arith.constant 0 : index
    %c0_35 = arith.constant 0 : index
    %68 = vector.load %arg9[%c0_33, %c0_34, %c0_35] : memref<1x1x8xf32, #tpu.memory_space<vmem>>, vector<1x1x8xf32>
    tpu.vector_store %arg9[%c0_33, %c0_34, %c0_35], %67 {strides = array<i32>} : memref<1x1x8xf32, #tpu.memory_space<vmem>>, vector<1x1x8xf32>,
    return
  }
  func.func @transform_0(%arg0: i32, %arg1: i32) -> (i32, i32, i32, i32) {
    %c2_i32 = arith.constant 2 : i32
    %0 = arith.muli %arg0, %c2_i32 : i32
    %1 = arith.addi %0, %arg1 : i32
    %c0_i32 = arith.constant 0 : i32
    %c0_i32_0 = arith.constant 0 : i32
    %c0_i32_1 = arith.constant 0 : i32
    %c0_i32_2 = arith.constant 0 : i32
    return %1, %c0_i32, %c0_i32_0, %c0_i32_1 : i32, i32, i32, i32
  }
  func.func @transform_1(%arg0: i32, %arg1: i32) -> (i32, i32, i32) {
    %c0_i32 = arith.constant 0 : i32
    %c0_i32_0 = arith.constant 0 : i32
    %c0_i32_1 = arith.constant 0 : i32
    return %arg0, %c0_i32, %c0_i32_0 : i32, i32, i32
  }
  func.func @transform_2(%arg0: i32, %arg1: i32) -> (i32, i32, i32) {
    %c0_i32 = arith.constant 0 : i32
    %c0_i32_0 = arith.constant 0 : i32
    %c0_i32_1 = arith.constant 0 : i32
    return %arg0, %c0_i32, %c0_i32_0 : i32, i32, i32
  }
  func.func @transform_3(%arg0: i32, %arg1: i32) -> (i32, i32) {
    %c0_i32 = arith.constant 0 : i32
    %c0_i32_0 = arith.constant 0 : i32
    %c0_i32_1 = arith.constant 0 : i32
    return %c0_i32, %c0_i32_0 : i32, i32
  }
  func.func @transform_4(%arg0: i32, %arg1: i32) -> (i32, i32) {
    %c0_i32 = arith.constant 0 : i32
    %c0_i32_0 = arith.constant 0 : i32
    %c0_i32_1 = arith.constant 0 : i32
    return %c0_i32, %c0_i32_0 : i32, i32
  }
  func.func @transform_5(%arg0: i32, %arg1: i32) -> (i32, i32, i32, i32) {
    %c0_i32 = arith.constant 0 : i32
    %c0_i32_0 = arith.constant 0 : i32
    %c0_i32_1 = arith.constant 0 : i32
    return %arg0, %arg1, %c0_i32, %c0_i32_0 : i32, i32, i32, i32
  }
  func.func @transform_6(%arg0: i32, %arg1: i32) -> (i32, i32, i32) {
    %c0_i32 = arith.constant 0 : i32
    %c0_i32_0 = arith.constant 0 : i32
    %c0_i32_1 = arith.constant 0 : i32
    return %arg0, %c0_i32, %c0_i32_0 : i32, i32, i32
  }
  func.func @transform_7(%arg0: i32, %arg1: i32) -> (i32, i32, i32) {
    %c0_i32 = arith.constant 0 : i32
    %c0_i32_0 = arith.constant 0 : i32
    %c0_i32_1 = arith.constant 0 : i32
    return %arg0, %c0_i32, %c0_i32_0 : i32, i32, i32
  }
}

module attributes {stable_mosaic.version = 11 : i64} {
  func.func @_sn_relu_kernel(%arg0: i32, %arg1: i32, %arg2: memref<1x16x128xbf16, #tpu.memory_space<vmem>>, %arg3: memref<1x1x128xf32, #tpu.memory_space<vmem>>, %arg4: memref<1x1x128xf32, #tpu.memory_space<vmem>>, %arg5: memref<1x16x128xf32, #tpu.memory_space<vmem>>) attributes {dimension_semantics = [#tpu.dimension_semantics<parallel>, #tpu.dimension_semantics<parallel>], iteration_bounds = array<i64: 2, 1>, scalar_prefetch = 0 : i64, scratch_operands = 0 : i64, tpu.core_type = #tpu.core_type<tc>, window_params = [{transform_indices = @transform_0, window_bounds = array<i64: 1, 16, 128>}, {transform_indices = @transform_1, window_bounds = array<i64: 1, 1, 128>}, {transform_indices = @transform_2, window_bounds = array<i64: 1, 1, 128>}, {transform_indices = @transform_3, window_bounds = array<i64: 1, 16, 128>}]} {
    %c0 = arith.constant 0 : index
    %c0_0 = arith.constant 0 : index
    %c0_1 = arith.constant 0 : index
    %0 = vector.load %arg2[%c0, %c0_0, %c0_1] : memref<1x16x128xbf16, #tpu.memory_space<vmem>>, vector<1x16x128xbf16>
    %1 = vector.shape_cast %0 : vector<1x16x128xbf16> to vector<16x128xbf16>
    %2 = arith.extf %1 : vector<16x128xbf16> to vector<16x128xf32>
    %c0_2 = arith.constant 0 : index
    %c0_3 = arith.constant 0 : index
    %c0_4 = arith.constant 0 : index
    %3 = vector.load %arg3[%c0_2, %c0_3, %c0_4] : memref<1x1x128xf32, #tpu.memory_space<vmem>>, vector<1x1x128xf32>
    %4 = vector.shape_cast %3 : vector<1x1x128xf32> to vector<1x128xf32>
    %5 = vector.broadcast %4 : vector<1x128xf32> to vector<16x128xf32>
    %6 = arith.mulf %2, %5 : vector<16x128xf32>
    %c0_5 = arith.constant 0 : index
    %c0_6 = arith.constant 0 : index
    %c0_7 = arith.constant 0 : index
    %7 = vector.load %arg4[%c0_5, %c0_6, %c0_7] : memref<1x1x128xf32, #tpu.memory_space<vmem>>, vector<1x1x128xf32>
    %8 = vector.shape_cast %7 : vector<1x1x128xf32> to vector<1x128xf32>
    %9 = vector.broadcast %8 : vector<1x128xf32> to vector<16x128xf32>
    %10 = arith.addf %6, %9 : vector<16x128xf32>
    %cst = arith.constant 0.000000e+00 : f32
    %11 = vector.broadcast %cst : f32 to vector<16x128xf32>
    %12 = arith.maximumf %10, %11 : vector<16x128xf32>
    %c0_8 = arith.constant 0 : index
    %c0_9 = arith.constant 0 : index
    %c0_10 = arith.constant 0 : index
    %13 = vector.load %arg5[%c0_8, %c0_9, %c0_10] : memref<1x16x128xf32, #tpu.memory_space<vmem>>, vector<1x16x128xf32>
    %14 = vector.shape_cast %13 : vector<1x16x128xf32> to vector<16x128xf32>
    %15 = vector.shape_cast %12 : vector<16x128xf32> to vector<1x16x128xf32>
    tpu.vector_store %arg5[%c0_8, %c0_9, %c0_10], %15 {strides = array<i32>} : memref<1x16x128xf32, #tpu.memory_space<vmem>>, vector<1x16x128xf32>,
    return
  }
  func.func @transform_0(%arg0: i32, %arg1: i32) -> (i32, i32, i32) {
    %c0_i32 = arith.constant 0 : i32
    %c0_i32_0 = arith.constant 0 : i32
    return %arg0, %arg1, %c0_i32 : i32, i32, i32
  }
  func.func @transform_1(%arg0: i32, %arg1: i32) -> (i32, i32, i32) {
    %c0_i32 = arith.constant 0 : i32
    %c0_i32_0 = arith.constant 0 : i32
    %c0_i32_1 = arith.constant 0 : i32
    return %arg0, %c0_i32, %c0_i32_0 : i32, i32, i32
  }
  func.func @transform_2(%arg0: i32, %arg1: i32) -> (i32, i32, i32) {
    %c0_i32 = arith.constant 0 : i32
    %c0_i32_0 = arith.constant 0 : i32
    %c0_i32_1 = arith.constant 0 : i32
    return %arg0, %c0_i32, %c0_i32_0 : i32, i32, i32
  }
  func.func @transform_3(%arg0: i32, %arg1: i32) -> (i32, i32, i32) {
    %c0_i32 = arith.constant 0 : i32
    %c0_i32_0 = arith.constant 0 : i32
    return %arg0, %arg1, %c0_i32 : i32, i32, i32
  }
}

</mosaic_0001>

<bundles_post_ra>
// kernel: double_conv_sn_forward.3
= control target key start
LH: loop header
LB: loop body
LE: loop exit
PB: predicated region body
PF: predicated region fallthrough
CT: control target
= control target key end

     0   :  { %s1436_s18 = smov 0   ;;  %s1438_s19 = smov 0   ;;  %s1905_s0 = inlined_call_operand.vmem [shape: bf16[4,10,18,4], index: 0, kind: input, shape index: {}]   ;;  %s1906_s1 = inlined_call_operand.vmem [shape: bf16[36,8], index: 1, kind: input, shape index: {}]   ;;  %s1907_s2 = inlined_call_operand.vmem [shape: f32[1,8], index: 2, kind: input, shape index: {}]   ;;  %s1908_s3 = inlined_call_operand.vmem [shape: bf16[2,16,16,8], index: 3, kind: output, shape index: {0}]   ;;  %s1909_s4 = inlined_call_operand.vmem [shape: f32[2,1,8], index: 4, kind: output, shape index: {1}]   ;;  %s1910_s5 = inlined_call_operand.vmem [shape: f32[2,1,8], index: 5, kind: output, shape index: {2}]  }
   0x1   :  { %s1440_s20 = smov 0   ;;  %s1442_s21 = smov 0  }
   0x2   :  { %s1444_s22 = smov 0  }
   0x3 LB: > { %s25_s23 = sadd.s32 1, %s1391_s20  ;;  %s28_s24 = sadd.s32 1, %s1395_s21  ;;  %s1399_s22 = sphi %s1444_s22, %s16_s22   ;;  %s1395_s21 = sphi %s1442_s21, %s1914_s21   ;;  %s1391_s20 = sphi %s1440_s20, %s1913_s20   ;;  %s1387_s19 = sphi %s1438_s19, %s1912_s19   ;;  %s1383_s18 = sphi %s1436_s18, %s1911_s18  }
   0x4   : > { %p26_p0 = scmp.ge.s32.totalorder %s25_s23, 2  ;;  %p1177_p1 = scmp.ge.s32.totalorder %s1399_s22, 1 }
   0x5   : > { %p214_p2 = scmp.lt.s32.totalorder %s1399_s22, 5 }
   0x6   : > { %s1916_s23 = smov (%p26_p0, %s25_s23), 0  ;;  %s1918_s24 = smov (!%p26_p0, %s28_s24), %s1395_s21 }
   0x7   : > { %p215_p3 = pnand %p1177_p1, %p214_p2  ;;  %p30_p4 = scmp.ge.s32.totalorder %s1918_s24, 2 }
   0x8   : > { %s1178_s25 = sshll.u32 (!%p215_p3), %s1387_s19, 1  ;;  %vm533_vm0 = vcmask (!%p215_p3), 1046528   ;;  %vm392_vm1 = vsmask.f32 (!%p215_p3), 7424  ;;  %s1401_s6 = smov (!%p215_p3), 8   ;;  %vm584_vm2 = vcmask (!%p215_p3), 31744  }
   0x9   : > { %s1920_s24 = smov (%p30_p4, %s1918_s24), 0  ;;  %218 = sbr.rel (%p215_p3) target bundleno = 567 (0x237), region = 32 }
   0xa   : > { %s256_s26 = sadd.s32 (!%p215_p3), %s1383_s18, %s1178_s25  ;;  %s1402_s7 = smov (!%p215_p3), 4   ;;  %vm745_vm3 = vcmask (!%p215_p3), 1041408   ;;  %vm605_vm4 = vcmask (!%p215_p3), 64512   ;;  %vm667_vm5 = vcmask (!%p215_p3), 97280   ;;  %vm684_vm6 = vcmask (!%p215_p3), 195584  }
   0xb   : > { %p257_p5 = scmp.lt.s32.totalorder (!%p215_p3), %s256_s26, 3  ;;  %s1403_s14 = smov (!%p215_p3), 12   ;;  %vm728_vm7 = vcmask (!%p215_p3), 293888   ;;  %vm910_vm8 = vcmask (!%p215_p3), 60416  }
   0xc   : > { %s1404_s15 = smov (!%p215_p3), 24   ;;  %p265_p6 = scmp.lt.s32.totalorder (!%p215_p3), %s1387_s19, 1 }
   0xd   : > { %s1180_s29 = sshll.u32 (!%p215_p3), %s1383_s18, 3  ;;  %p1232_p8 = scmp.ne.s32.totalorder (!%p215_p3), %s1383_s18, 0 }
   0xe   : > { %p267_p7 = scmp.lt.s32.totalorder (!%p215_p3), %s1180_s29, 15 }
  0x10   : > { %s1922_s26 = smov (!%p257_p5, %s256_s26), 3  ;;  %s1924_s19 = smov (!%p265_p6, %s1387_s19), 1 }
  0x11   : > { %s1292_s27 = smul.u32 120, %s1922_s26  ;;  %s1663_s25 = scalar_lea.vmem %s1909_s4, %s1924_s19  ;;  %vm931_vm9 = vcmask (!%p1232_p8), 57344  }
  0x12   : > { %s1669_s28 = scalar_lea.vmem %s1910_s5, %s1924_s19  ;;  %s1926_s29 = smov (!%p267_p7, %s1180_s29), 15 }
  0x13   : > { %s1475_s30 = scalar_lea.vmem %s1905_s0, %s1292_s27 }
  0x14   : > { %v1478_v0 = vld [vmem:[%s1475_s30 + $0x3c] sm:$0xff]   ;;  %v1339_v1 = vld [vmem:[%s1475_s30 + $0x44] ss:$0 sps:$4 sm:$0x11]   ;;  %v1482_v2 = vld [vmem:[%s1475_s30 + $0xc] sm:$0xff]  }
  0x15   : > { %v549_v3 = vrot.slane %v1478_v0, 1  ;;  %v550_v4 = vrot.slane %v1339_v1, 1  ;;  %v1341_v5 = vld [vmem:[%s1475_s30 + $0x14] ss:$0 sps:$4 sm:$0x11]   ;;  %v1487_v6 = vld [vmem:[%s1475_s30 + $0x48] sm:$0xff]  }
  0x16   : > { %v537_v7 = vrot.slane %v1482_v2, 1  ;;  %v1491_v8 = vld [vmem:[%s1475_s30 + $0x18] sm:$0xff]   ;;  %v538_v10 = vrot.slane %v1341_v5, 1  ;;  %v1343_v11 = vld [vmem:[%s1475_s30 + $0x50] ss:$0 sps:$4 sm:$0x11]  }
  0x17   : > { %v551_v9 = vsel %vm533_vm0, %v549_v3, %v550_v4  ;;  %v552_v12 = vrot.slane %v1487_v6, 1  ;;  %v540_v13 = vrot.slane %v1491_v8, 1  ;;  %v553_v15 = vrot.slane %v1343_v11, 1  ;;  %v1345_v16 = vld [vmem:[%s1475_s30 + $0x20] ss:$0 sps:$4 sm:$0x11]  }
  0x18   : > { %574 = vrot.lane.b32.xlu1 %v551_v9, %s1401_s6  ;;  %v539_v14 = vsel %vm533_vm0, %v537_v7, %v538_v10  ;;  %v418_v17 = vshrl.u32 %v1491_v8, 16  ;;  %v420_v18 = vshll.u32 %v1491_v8, 16  ;;  %v406_v19 = vshrl.u32 %v1482_v2, 16  ;;  %v1507_v25 = vld [vmem:[%s1475_s30 + $0x54] sm:$0xff]   ;;  %v1522_v47 = vld [vmem:[%s1475_s30 + $0x24] sm:$0xff]   ;;  %v1538_v63 = vld [vmem:[%s1475_s30 + $0x6c] sm:$0xff]  }
  0x19   : > { %566 = vrot.lane.b32.xlu0 %v539_v14, %s1401_s6  ;;  %v408_v20 = vshll.u32 %v1482_v2, 16  ;;  %v554_v21 = vsel %vm533_vm0, %v552_v12, %v553_v15  ;;  %v541_v22 = vrot.slane %v1345_v16, 1  ;;  %v425_v23 = vshll.u32 %v1345_v16, 16  ;;  %v1347_v34 = vld [vmem:[%s1475_s30 + $0x5c] ss:$0 sps:$4 sm:$0x11]  }
  0x1a   : > { %v413_v24 = vshll.u32 %v1341_v5, 16  ;;  %v422_v26 = vrot.slane %v420_v18, 1  ;;  %v466_v28 = vshrl.u32 %v1487_v6, 16  ;;  %v468_v29 = vshll.u32 %v1487_v6, 16  ;;  %v1526_v49 = vld [vmem:[%s1475_s30 + $0x60] sm:$0xff]   ;;  %v1535_v58 = vld [vmem:[%s1475_s30 + $0x30] sm:$0xff]  }
  0x1b   : > { %v410_v27 = vrot.slane %v408_v20, 1  ;;  %v542_v30 = vsel %vm533_vm0, %v540_v13, %v541_v22  ;;  %v427_v31 = vrot.slane %v425_v23, 1  ;;  %v473_v33 = vshll.u32 %v1343_v11, 16  ;;  %v1349_v48 = vld [vmem:[%s1475_s30 + $0x2c] ss:$0 sps:$4 sm:$0x11]  }
  0x1c   : > { %576 = vrot.lane.b32.xlu1 %v554_v21, %s1401_s6  ;;  %v415_v32 = vrot.slane %v413_v24, 1  ;;  %v423_v35 = vor.u32 %v422_v26, %v418_v17  ;;  %v470_v37 = vrot.slane %v468_v29, 1  ;;  %v454_v38 = vshrl.u32 %v1478_v0, 16  ;;  %v1351_v7 = vld [vmem:[%s1475_s30 + $0x68] ss:$0 sps:$4 sm:$0x11]  }
  0x1d   : > { %568 = vrot.lane.b32.xlu0 %v542_v30, %s1401_s6  ;;  %v411_v36 = vor.u32 %v410_v27, %v406_v19  ;;  %v475_v39 = vrot.slane %v473_v33, 1  ;;  %v456_v40 = vshll.u32 %v1478_v0, 16  ;;  %v461_v41 = vshll.u32 %v1339_v1, 16  ;;  %v1353_v15 = vld [vmem:[%s1475_s30 + $0x38] ss:$0 sps:$4 sm:$0x11]  }
  0x1e   : > { %v478_v42 = vshrl.u32 %v1507_v25, 16  ;;  %v428_v43 = vsel %vm392_vm1, %v423_v35, %v427_v31  ;;  %v471_v45 = vor.u32 %v470_v37, %v466_v28  ;;  %v480_v46 = vshll.u32 %v1507_v25, 16  ;;  %v1355_v29 = vld [vmem:[%s1475_s30 + $0x74] ss:$0 sps:$4 sm:$0x11]  }
  0x1f   : > { %v416_v44 = vsel %vm392_vm1, %v411_v36, %v415_v32  ;;  %v458_v50 = vrot.slane %v456_v40, 1  ;;  %v463_v51 = vrot.slane %v461_v41, 1  ;;  %v485_v52 = vshll.u32 %v1347_v34, 16 }
  0x20   : > { %517 = vrot.lane.b32.xlu1 %v428_v43, %s1402_s7  ;;  %v555_v53 = vrot.slane %v1507_v25, 1  ;;  %v476_v54 = vsel %vm392_vm1, %v471_v45, %v475_v39  ;;  %v482_v55 = vrot.slane %v480_v46, 1  ;;  %v430_v56 = vshrl.u32 %v1522_v47, 16 }
  0x21   : > { %515 = vrot.lane.b32.xlu0 %v416_v44, %s1402_s7  ;;  %v432_v57 = vshll.u32 %v1522_v47, 16  ;;  %v459_v59 = vor.u32 %v458_v50, %v454_v38  ;;  %v487_v60 = vrot.slane %v485_v52, 1  ;;  %v437_v61 = vshll.u32 %v1349_v48, 16 }
  0x22   : > { %v556_v62 = vrot.slane %v1347_v34, 1  ;;  %v483_v1 = vor.u32 %v482_v55, %v478_v42  ;;  %v543_v4 = vrot.slane %v1522_v47, 1  ;;  %v544_v5 = vrot.slane %v1349_v48, 1  ;;  %v1560_v34 = vld [vmem:[%s1475_s30] sm:$0xff]  }
  0x23   : > { %v434_v3 = vrot.slane %v432_v57, 1  ;;  %v464_v9 = vsel %vm392_vm1, %v459_v59, %v463_v51  ;;  %v439_v10 = vrot.slane %v437_v61, 1  ;;  %v490_v11 = vshrl.u32 %v1526_v49, 16  ;;  %v1357_v42 = vld [vmem:[%s1475_s30 + $0x8] ss:$0 sps:$4 sm:$0x11]  }
  0x24   : > { %525 = vrot.lane.b32.xlu1 %v476_v54, %s1402_s7  ;;  %v488_v12 = vsel %vm392_vm1, %v483_v1, %v487_v60  ;;  %v492_v14 = vshll.u32 %v1526_v49, 16  ;;  %v497_v16 = vshll.u32 %v1351_v7, 16  ;;  %v442_v17 = vshrl.u32 %v1535_v58, 16  ;;  %s1181_s30 = sshll.u32 %s1926_s29, 1 }
  0x25   : > { %523 = vrot.lane.b32.xlu0 %v464_v9, %s1402_s7  ;;  %v435_v13 = vor.u32 %v434_v3, %v430_v56  ;;  %v444_v18 = vshll.u32 %v1535_v58, 16  ;;  %v449_v21 = vshll.u32 %v1353_v15, 16  ;;  %v504_v23 = vshll.u32 %v1538_v63, 16  ;;  %v1358_v3 = vld [vmem:[%s1906_s1] sm:$0xff]  }
  0x26   : > { %v494_v20 = vrot.slane %v492_v14, 1  ;;  %v557_v24 = vsel %vm533_vm0, %v555_v53, %v556_v62  ;;  %v545_v26 = vsel %vm533_vm0, %v543_v4, %v544_v5  ;;  %v499_v28 = vrot.slane %v497_v16, 1  ;;  %1262 = vmatprep.subr.bf16.mxu0 %v1358_v3  ;;  %1284 = vmatprep.subr.bf16.mxu1 %v1358_v3 }
  0x27   : > { %v440_v19 = vsel %vm392_vm1, %v435_v13, %v439_v10  ;;  %v446_v22 = vrot.slane %v444_v18, 1  ;;  %v451_v31 = vrot.slane %v449_v21, 1  ;;  %v502_v32 = vshrl.u32 %v1538_v63, 16  ;;  %1263 = vmatpush3.bf16.msra.mxu0 %v1358_v3  ;;  %1287 = vmatpush3.bf16.msra.mxu1 %v1358_v3 }
  0x28   : > { %527 = vrot.lane.b32.xlu1 %v488_v12, %s1402_s7  ;;  %v495_v27 = vor.u32 %v494_v20, %v490_v11  ;;  %v506_v33 = vrot.slane %v504_v23, 1  ;;  %v509_v35 = vshll.u32 %v1355_v29, 16  ;;  %v546_v36 = vrot.slane %v1535_v58, 1  ;;  %v1360_v11 = vld [vmem:[%s1906_s1 + $0x10] ss:$0 sps:$4 sm:$0x33]  }
  0x29   : > { %519 = vrot.lane.b32.xlu0 %v440_v19, %s1402_s7  ;;  %v447_v30 = vor.u32 %v446_v22, %v442_v17  ;;  %v547_v37 = vrot.slane %v1353_v15, 1  ;;  %v396_v43 = vshll.u32 %v1560_v34, 16  ;;  %v561_v45 = vrot.slane %v1538_v63, 1 }
  0x2a   : > { %v500_v38 = vsel %vm392_vm1, %v495_v27, %v499_v28  ;;  %v507_v40 = vor.u32 %v506_v33, %v502_v32  ;;  %v511_v41 = vrot.slane %v509_v35, 1  ;;  %v562_v46 = vrot.slane %v1355_v29, 1 }
  0x2b   : > { %v452_v39 = vsel %vm392_vm1, %v447_v30, %v451_v31  ;;  %v548_v44 = vsel %vm533_vm0, %v546_v36, %v547_v37  ;;  %v558_v48 = vrot.slane %v1526_v49, 1  ;;  %v559_v50 = vrot.slane %v1351_v7, 1  ;;  %v1359_v7 = vld [vmem:[%s1906_s1 + $0x8] sm:$0xff]  }
  0x2c   : > { %578 = vrot.lane.b32.xlu1 %v557_v24, %s1401_s6  ;;  %v512_v51 = vsel %vm392_vm1, %v507_v40, %v511_v41  ;;  %v394_v52 = vshrl.u32 %v1560_v34, 16  ;;  %v398_v53 = vrot.slane %v396_v43, 1  ;;  %v401_v54 = vshll.u32 %v1357_v42, 16  ;;  %1264 = vmatprep.subr.bf16.mxu0 %v1359_v7 }
  0x2d   : > { %570 = vrot.lane.b32.xlu0 %v545_v26, %s1401_s6  ;;  %v563_v55 = vsel %vm533_vm0, %v561_v45, %v562_v46  ;;  %v534_v56 = vrot.slane %v1560_v34, 1  ;;  %v535_v57 = vrot.slane %v1357_v42, 1  ;;  %v560_v59 = vsel %vm533_vm0, %v558_v48, %v559_v50  ;;  %1285 = vmatprep.subr.bf16.mxu1 %v1359_v7 }
  0x2e   : > { %v399_v60 = vor.u32 %v398_v53, %v394_v52  ;;  %v403_v61 = vrot.slane %v401_v54, 1  ;;  %1265 = vmatpush3.bf16.msra.mxu0 %v1359_v7  ;;  %1288 = vmatpush3.bf16.msra.mxu1 %v1359_v7  ;;  %v747_v13 = vsel %vm745_vm3, %v1360_v11, 0 }
  0x2f   : > { %v536_v62 = vsel %vm533_vm0, %v534_v56, %v535_v57  ;;  %1290 = vmatprep.subr.msk.bf16.mxu0 %vm745_vm3, %v1360_v11  ;;  %1291 = vmatprep.subr.msk.bf16.mxu1 %vm745_vm3, %v1360_v11 }
  0x30   : > { %529 = vrot.lane.b32.xlu1 %v500_v38, %s1402_s7  ;;  %v404_v1 = vsel %vm392_vm1, %v399_v60, %v403_v61 }
  0x31   : > { %521 = vrot.lane.b32.xlu0 %v452_v39, %s1402_s7 }
  0x32   : > { %1267 = vmatpush3.bf16.msra.mxu0 %v747_v13  ;;  %1289 = vmatpush3.bf16.msra.mxu1 %v747_v13 }
  0x34   : > { %572 = vrot.lane.b32.xlu1 %v548_v44, %s1401_s6 }
  0x35   : > { %531 = vrot.lane.b32.xlu0 %v512_v51, %s1402_s7 }
  0x38   : > { %582 = vrot.lane.b32.xlu1 %v563_v55, %s1401_s6 }
  0x39   : > { %580 = vrot.lane.b32.xlu0 %v560_v59, %s1401_s6 }
  0x3c   : > { %564 = vrot.lane.b32.xlu1 %v536_v62, %s1401_s6  ;;  %s1182_s6 = sshll.u32 %s1924_s19, 5 }
  0x3d   : > { %513 = vrot.lane.b32.xlu0 %v404_v1, %s1402_s7  ;;  %s271_s7 = sadd.s32 %s1182_s6, %s1181_s30 }
  0x3e   : > { %s1183_s10 = sshll.u32 %s271_s7, 2 }
  0x3f   : > { %s1721_s13 = scalar_lea.vmem %s1908_s3, %s1183_s10 }
  0x8a   : > { %v575_v4 = vpop.permute.xlu1 %574 }
  0x8b   : > { %v567_v5 = vpop.permute.xlu0 %566 }
  0x8e   : > { %v577_v9 = vpop.permute.xlu1 %576 }
  0x8f   : > { %v569_v10 = vpop.permute.xlu0 %568 }
  0x92   : > { %v518_v12 = vpop.permute.xlu1 %517 }
  0x93   : > { %v516_v14 = vpop.permute.xlu0 %515  ;;  %v590_v17 = vsel %vm584_vm2, %v1491_v8, %v518_v12 }
  0x94   : > { %v588_v15 = vsel %vm584_vm2, %v1482_v2, %v516_v14  ;;  %v1611_v2 = vsel %vm605_vm4, %v590_v17, %v569_v10  ;;  %v1204_v17 = vld [vmem:[%s1907_s2] ss:$0 sm:$0xff] }
  0x95   : > { %v1599_v16 = vsel %vm605_vm4, %v588_v15, %v567_v5 }
  0x96   : > { %634 = vrot.lane.b32.xlu0 %v1599_v16, %s1403_s14  ;;  %v526_v18 = vpop.permute.xlu1 %525 }
  0x97   : > { %v524_v19 = vpop.permute.xlu0 %523  ;;  %v598_v22 = vsel %vm584_vm2, %v1487_v6, %v526_v18 }
  0x98   : > { %v596_v20 = vsel %vm584_vm2, %v1478_v0, %v524_v19  ;;  %v1620_v24 = vsel %vm605_vm4, %v598_v22, %v577_v9 }
  0x99   : > { %v1608_v21 = vsel %vm605_vm4, %v596_v20, %v575_v4 }
  0x9a   : > { %642 = vrot.lane.b32.xlu1 %v1608_v21, %s1403_s14  ;;  %636 = vrot.lane.b32.xlu0 %v1611_v2, %s1403_s14  ;;  %v528_v8 = vpop.permute.xlu1 %527 }
  0x9b   : > { %v520_v23 = vpop.permute.xlu0 %519  ;;  %v600_v28 = vsel %vm584_vm2, %v1507_v25, %v528_v8 }
  0x9c   : > { %v592_v6 = vsel %vm584_vm2, %v1522_v47, %v520_v23 }
  0x9e   : > { %644 = vrot.lane.b32.xlu1 %v1620_v24, %s1403_s14  ;;  %651 = vrot.lane.b32.xlu0 %v1611_v2, %s1404_s15  ;;  %v579_v0 = vpop.permute.xlu1 %578 }
  0x9f   : > { %v571_v26 = vpop.permute.xlu0 %570  ;;  %v1638_v31 = vsel %vm605_vm4, %v600_v28, %v579_v0 }
  0xa0   : > { %v1629_v27 = vsel %vm605_vm4, %v592_v6, %v571_v26 }
  0xa2   : > { %659 = vrot.lane.b32.xlu1 %v1620_v24, %s1404_s15  ;;  %653 = vrot.lane.b32.xlu0 %v1629_v27, %s1404_s15  ;;  %v530_v29 = vpop.permute.xlu1 %529 }
  0xa3   : > { %v522_v30 = vpop.permute.xlu0 %521 }
  0xa4   : > { %v594_v47 = vsel %vm584_vm2, %v1535_v58, %v522_v30  ;;  %v602_v58 = vsel %vm584_vm2, %v1526_v49, %v530_v29 }
  0xa6   : > { %661 = vrot.lane.b32.xlu1 %v1638_v31, %s1404_s15  ;;  %638 = vrot.lane.b32.xlu0 %v1629_v27, %s1403_s14  ;;  %v573_v25 = vpop.permute.xlu1 %572 }
  0xa7   : > { %v532_v32 = vpop.permute.xlu0 %531  ;;  %v615_v33 = vsel %vm605_vm4, %v594_v47, %v573_v25 }
  0xa8   : > { %v604_v41 = vsel %vm584_vm2, %v1538_v63, %v532_v32 }
  0xaa   : > { %646 = vrot.lane.b32.xlu1 %v1638_v31, %s1403_s14  ;;  %640 = vrot.lane.b32.xlu0 %v615_v33, %s1403_s14  ;;  %v583_v35 = vpop.permute.xlu1 %582 }
  0xab   : > { %v581_v36 = vpop.permute.xlu0 %580  ;;  %v625_v42 = vsel %vm605_vm4, %v604_v41, %v583_v35 }
  0xac   : > { %v623_v37 = vsel %vm605_vm4, %v602_v58, %v581_v36 }
  0xae   : > { %648 = vrot.lane.b32.xlu1 %v623_v37, %s1403_s14  ;;  %655 = vrot.lane.b32.xlu0 %v615_v33, %s1404_s15  ;;  %v565_v38 = vpop.permute.xlu1 %564 }
  0xaf   : > { %v514_v39 = vpop.permute.xlu0 %513 }
  0xb0   : > { %v586_v49 = vsel %vm584_vm2, %v1560_v34, %v514_v39 }
  0xb1   : > { %v607_v40 = vsel %vm605_vm4, %v586_v49, %v565_v38 }
  0xb2   : > { %663 = vrot.lane.b32.xlu1 %v623_v37, %s1404_s15  ;;  %657 = vrot.lane.b32.xlu0 %v1608_v21, %s1404_s15 }
  0xb6   : > { %665 = vrot.lane.b32.xlu1 %v625_v42, %s1404_s15 }
 0x108   : > { %v635_v43 = vpop.permute.xlu0 %634 }
 0x109   : > { %v669_v34 = vsel %vm667_vm5, %v607_v40, %v635_v43 }
 0x10c   : > { %v643_v44 = vpop.permute.xlu1 %642  ;;  %v637_v45 = vpop.permute.xlu0 %636 }
 0x10d   : > { %v677_v63 = vsel %vm667_vm5, %v615_v33, %v643_v44  ;;  %v671_v51 = vsel %vm667_vm5, %v1599_v16, %v637_v45 }
 0x110   : > { %v645_v46 = vpop.permute.xlu1 %644  ;;  %v652_v48 = vpop.permute.xlu0 %651 }
 0x111   : > { %v686_v50 = vsel %vm684_vm6, %v669_v34, %v652_v48  ;;  %v679_v56 = vsel %vm667_vm5, %v1608_v21, %v645_v46 }
 0x112   : > { %1268 = vmatprep.mubr.msk.bf16.mxu0 %vm728_vm7, %v686_v50 }
 0x114   : > { %v660_v52 = vpop.permute.xlu1 %659  ;;  %v654_v53 = vpop.permute.xlu0 %653 }
 0x115   : > { %v688_v54 = vsel %vm684_vm6, %v671_v51, %v654_v53  ;;  %v694_v55 = vsel %vm684_vm6, %v677_v63, %v660_v52 }
 0x116   : > { %1269 = vmatmul.mubr.msk.bf16.vlgmr.msra.gmra.mrb[0].mxu0 %vm728_vm7, %v688_v54  ;;  %1276 = vmatprep.mubr.msk.bf16.mxu1 %vm728_vm7, %v694_v55 }
 0x118   : > { %v662_v57 = vpop.permute.xlu1 %661  ;;  %v639_v59 = vpop.permute.xlu0 %638 }
 0x119   : > { %v696_v60 = vsel %vm684_vm6, %v679_v56, %v662_v57  ;;  %v673_v1 = vsel %vm667_vm5, %v1611_v2, %v639_v59 }
 0x11a   : > { %1277 = vmatmul.mubr.msk.bf16.vlgmr.msra.gmra.mrb[0].mxu1 %vm728_vm7, %v696_v60 }
 0x11c   : > { %v647_v61 = vpop.permute.xlu1 %646  ;;  %v641_v62 = vpop.permute.xlu0 %640 }
 0x11d   : > { %v681_v7 = vsel %vm667_vm5, %v1620_v24, %v647_v61  ;;  %v675_v9 = vsel %vm667_vm5, %v1629_v27, %v641_v62  ;;  %v1405_v61 = vmov (!%p1232_p8), 0.0  }
 0x11e   : > { %932 = vst.msk [vmem:[%s1663_s25] sm:$0x1] (!%p1232_p8), %vm931_vm9, %v1405_v61  ;;  %933 = vst.msk [vmem:[%s1669_s28] sm:$0x1] (!%p1232_p8), %vm931_vm9, %v1405_v61 }
 0x120   : > { %v649_v3 = vpop.permute.xlu1 %648  ;;  %v656_v4 = vpop.permute.xlu0 %655 }
 0x121   : > { %v690_v5 = vsel %vm684_vm6, %v673_v1, %v656_v4  ;;  %v683_v14 = vsel %vm667_vm5, %v1638_v31, %v649_v3 }
 0x122   : > { %1272 = vmatprep.mubr.msk.bf16.mxu0 %vm728_vm7, %v690_v5 }
 0x124   : > { %v664_v10 = vpop.permute.xlu1 %663  ;;  %v658_v11 = vpop.permute.xlu0 %657 }
 0x125   : > { %v698_v12 = vsel %vm684_vm6, %v681_v7, %v664_v10  ;;  %v692_v13 = vsel %vm684_vm6, %v675_v9, %v658_v11 }
 0x126   : > { %1273 = vmatmul.mubr.msk.bf16.gmra.mrb[4].mxu0 %vm728_vm7, %v692_v13  ;;  %1280 = vmatprep.mubr.msk.bf16.mxu1 %vm728_vm7, %v698_v12 }
 0x128   : > { %v666_v15 = vpop.permute.xlu1 %665 }
 0x129   : > { %v700_v16 = vsel %vm684_vm6, %v683_v14, %v666_v15 }
 0x12a   : > { %1281 = vmatmul.mubr.msk.bf16.gmra.mrb[4].mxu1 %vm728_vm7, %v700_v16 }
 0x1e9   : > { %v1270_v18 = vpop.f32.mrb[0].mxu0 }
 0x1ea   : > { %v1716_v19 = vadd.f32 %v1270_v18, %v1204_v17  ;;  %v783_v20 = vpop.f32.mrb[1].mxu0 }
 0x1eb   : > { %v1723_v21 = vadd.f32 %v1204_v17, %v783_v20  ;;  %v1271_v2 = vpop.f32.mrb[2].mxu0 }
 0x1ec   : > { %v1237_v22 = vpack.c.bf16 %v1716_v19, %v1716_v19  ;;  %v1727_v8 = vadd.f32 %v1271_v2, %v1204_v17  ;;  %v786_v23 = vpop.f32.mrb[3].mxu0 }
 0x1ed   : > { %v1235_v24 = vpack.c.bf16 %v1723_v21, %v1723_v21  ;;  %v1731_v0 = vadd.f32 %v1204_v17, %v786_v23  ;;  %v1278_v6 = vpop.f32.mrb[0].mxu1 }
 0x1ee   : > { %913 = vst.msk [vmem:[%s1721_s13 + $0x8] sm:$0xf] %vm910_vm8, %v1237_v22  ;;  %v1238_v26 = vpack.c.bf16 %v1727_v8, %v1727_v8  ;;  %v1737_v27 = vadd.f32 %v1278_v6, %v1204_v17  ;;  %v815_v28 = vpop.f32.mrb[1].mxu1 }
 0x1ef   : > { %911 = vst.msk [vmem:[%s1721_s13] sm:$0xf] %vm910_vm8, %v1235_v24  ;;  %v1236_v29 = vpack.c.bf16 %v1731_v0, %v1731_v0  ;;  %v1743_v30 = vadd.f32 %v1204_v17, %v815_v28  ;;  %v1279_v31 = vpop.f32.mrb[2].mxu1 }
 0x1f0   : > { %914 = vst.msk [vmem:[%s1721_s13 + $0xc] sm:$0xf] %vm910_vm8, %v1238_v26  ;;  %v1245_v47 = vpack.c.bf16 %v1737_v27, %v1737_v27  ;;  %v1749_v25 = vadd.f32 %v1279_v31, %v1204_v17  ;;  %v818_v32 = vpop.f32.mrb[3].mxu1 }
 0x1f1   : > { %912 = vst.msk [vmem:[%s1721_s13 + $0x4] sm:$0xf] %vm910_vm8, %v1236_v29  ;;  %v1243_v33 = vpack.c.bf16 %v1743_v30, %v1743_v30  ;;  %v1755_v35 = vadd.f32 %v1204_v17, %v818_v32 }
 0x1f2   : > { %921 = vst.msk [vmem:[%s1721_s13 + $0x28] sm:$0xf] %vm910_vm8, %v1245_v47  ;;  %v1246_v58 = vpack.c.bf16 %v1749_v25, %v1749_v25 }
 0x1f3   : > { %919 = vst.msk [vmem:[%s1721_s13 + $0x20] sm:$0xf] %vm910_vm8, %v1243_v33  ;;  %v1244_v36 = vpack.c.bf16 %v1755_v35, %v1755_v35 }
 0x1f4   : > { %922 = vst.msk [vmem:[%s1721_s13 + $0x2c] sm:$0xf] %vm910_vm8, %v1246_v58 }
 0x1f5   : > { %920 = vst.msk [vmem:[%s1721_s13 + $0x24] sm:$0xf] %vm910_vm8, %v1244_v36 }
 0x1f9   : > { %v1274_v37 = vpop.f32.mrb[4].mxu0 }
 0x1fa   : > { %v1769_v38 = vadd.f32 %v1274_v37, %v1204_v17  ;;  %v799_v39 = vpop.f32.mrb[5].mxu0 }
 0x1fb   : > { %v800_v49 = vadd.f32 %v1204_v17, %v799_v39  ;;  %v1275_v40 = vpop.f32.mrb[6].mxu0 }
 0x1fc   : > { %v1241_v41 = vpack.c.bf16 %v1769_v38, %v1769_v38  ;;  %v1773_v42 = vadd.f32 %v1275_v40, %v1204_v17  ;;  %v802_v43 = vpop.f32.mrb[7].mxu0 }
 0x1fd   : > { %v1239_v44 = vpack.c.bf16 %v800_v49, %v800_v49  ;;  %v803_v45 = vadd.f32 %v1204_v17, %v802_v43  ;;  %v1282_v34 = vpop.f32.mrb[4].mxu1 }
 0x1fe   : > { %917 = vst.msk [vmem:[%s1721_s13 + $0x18] sm:$0xf] %vm910_vm8, %v1241_v41  ;;  %v1242_v46 = vpack.c.bf16 %v1773_v42, %v1773_v42  ;;  %v1779_v48 = vadd.f32 %v1282_v34, %v1204_v17  ;;  %v831_v50 = vpop.f32.mrb[5].mxu1 }
 0x1ff   : > { %915 = vst.msk [vmem:[%s1721_s13 + $0x10] sm:$0xf] %vm910_vm8, %v1239_v44  ;;  %v1240_v63 = vpack.c.bf16 %v803_v45, %v803_v45  ;;  %v1783_v51 = vadd.f32 %v1204_v17, %v831_v50  ;;  %v1283_v52 = vpop.f32.mrb[6].mxu1  ;;  %930 = sbr.rel (%p1232_p8) target bundleno = 518 (0x206), region = 36 }
 0x200   : > { %918 = vst.msk [vmem:[%s1721_s13 + $0x1c] sm:$0xf] %vm910_vm8, %v1242_v46  ;;  %v1249_v53 = vpack.c.bf16 %v1779_v48, %v1779_v48  ;;  %v1789_v54 = vadd.f32 %v1283_v52, %v1204_v17  ;;  %v834_v55 = vpop.f32.mrb[7].mxu1 }
 0x201   : > { %916 = vst.msk [vmem:[%s1721_s13 + $0x14] sm:$0xf] %vm910_vm8, %v1240_v63  ;;  %v1247_v56 = vpack.c.bf16 %v1783_v51, %v1783_v51  ;;  %v1795_v57 = vadd.f32 %v1204_v17, %v834_v55 }
 0x202   : > { %925 = vst.msk [vmem:[%s1721_s13 + $0x38] sm:$0xf] %vm910_vm8, %v1249_v53  ;;  %v1250_v59 = vpack.c.bf16 %v1789_v54, %v1789_v54 }
 0x203   : > { %923 = vst.msk [vmem:[%s1721_s13 + $0x30] sm:$0xf] %vm910_vm8, %v1247_v56  ;;  %v1248_v60 = vpack.c.bf16 %v1795_v57, %v1795_v57 }
 0x204   : > { %926 = vst.msk [vmem:[%s1721_s13 + $0x3c] sm:$0xf] %vm910_vm8, %v1250_v59 }
 0x205   : > { %924 = vst.msk [vmem:[%s1721_s13 + $0x34] sm:$0xf] %vm910_vm8, %v1248_v60 }
 0x206 PF: > { %v935_v62 = vsel %vm605_vm4, %v1723_v21, 0.0  ;;  %v936_v1 = vsel %vm605_vm4, %v1731_v0, 0.0  ;;  %v938_v3 = vsel %vm605_vm4, %v1716_v19, 0.0  ;;  %v940_v5 = vsel %vm605_vm4, %v1727_v8, 0.0 }
 0x207   : > { %v937_v4 = vadd.f32 %v936_v1, %v935_v62  ;;  %v942_v9 = vsel %vm605_vm4, %v800_v49, 0.0  ;;  %v976_v11 = vmul.f32 %v1723_v21, %v1723_v21  ;;  %v977_v12 = vmul.f32 %v1731_v0, %v1731_v0 }
 0x208   : > { %v944_v13 = vsel %vm605_vm4, %v803_v45, 0.0  ;;  %v978_v14 = vmul.f32 %v1716_v19, %v1716_v19  ;;  %v979_v16 = vmul.f32 %v1727_v8, %v1727_v8  ;;  %v946_v17 = vsel %vm605_vm4, %v1769_v38, 0.0 }
 0x209   : > { %v939_v7 = vadd.f32 %v938_v3, %v937_v4  ;;  %v980_v20 = vmul.f32 %v800_v49, %v800_v49  ;;  %v992_v2 = vsel %vm605_vm4, %v976_v11, 0.0  ;;  %v993_v21 = vsel %vm605_vm4, %v977_v12, 0.0 }
 0x20a   : > { %v948_v22 = vsel %vm605_vm4, %v1773_v42, 0.0  ;;  %v994_v23 = vadd.f32 %v993_v21, %v992_v2  ;;  %v995_v24 = vsel %vm605_vm4, %v978_v14, 0.0  ;;  %v981_v0 = vmul.f32 %v803_v45, %v803_v45 }
 0x20b   : > { %v941_v10 = vadd.f32 %v940_v5, %v939_v7  ;;  %v997_v6 = vsel %vm605_vm4, %v979_v16, 0.0  ;;  %v950_v8 = vsel %vm605_vm4, %v1743_v30, 0.0  ;;  %v982_v29 = vmul.f32 %v1769_v38, %v1769_v38 }
 0x20c   : > { %v996_v26 = vadd.f32 %v995_v24, %v994_v23  ;;  %v999_v31 = vsel %vm605_vm4, %v980_v20, 0.0  ;;  %v952_v47 = vsel %vm605_vm4, %v1755_v35, 0.0  ;;  %v983_v58 = vmul.f32 %v1773_v42, %v1773_v42  ;;  %v934_v23 = vld [vmem:[%s1663_s25] sm:$0x1] }
 0x20d   : > { %v943_v15 = vadd.f32 %v942_v9, %v941_v10  ;;  %v1001_v36 = vsel %vm605_vm4, %v981_v0, 0.0  ;;  %v954_v37 = vsel %vm605_vm4, %v1737_v27, 0.0  ;;  %v984_v38 = vmul.f32 %v1743_v30, %v1743_v30 }
 0x20e   : > { %v998_v32 = vadd.f32 %v997_v6, %v996_v26  ;;  %v1003_v40 = vsel %vm605_vm4, %v982_v29, 0.0  ;;  %v956_v41 = vsel %vm605_vm4, %v1749_v25, 0.0  ;;  %v985_v42 = vmul.f32 %v1755_v35, %v1755_v35 }
 0x20f   : > { %v945_v18 = vadd.f32 %v944_v13, %v943_v15  ;;  %v1005_v45 = vsel %vm605_vm4, %v983_v58, 0.0  ;;  %v958_v34 = vsel %vm605_vm4, %v1783_v51, 0.0  ;;  %v986_v30 = vmul.f32 %v1737_v27, %v1737_v27 }
 0x210   : > { %v1000_v39 = vadd.f32 %v999_v31, %v998_v32  ;;  %v1007_v63 = vsel %vm605_vm4, %v984_v38, 0.0  ;;  %v960_v52 = vsel %vm605_vm4, %v1795_v57, 0.0  ;;  %v987_v35 = vmul.f32 %v1749_v25, %v1749_v25 }
 0x211   : > { %v947_v19 = vadd.f32 %v946_v17, %v945_v18  ;;  %v1009_v56 = vsel %vm605_vm4, %v985_v42, 0.0  ;;  %v962_v59 = vsel %vm605_vm4, %v1779_v48, 0.0  ;;  %v988_v27 = vmul.f32 %v1783_v51, %v1783_v51 }
 0x212   : > { %v1002_v43 = vadd.f32 %v1001_v36, %v1000_v39  ;;  %v1011_v62 = vsel %vm605_vm4, %v986_v30, 0.0  ;;  %v964_v1 = vsel %vm605_vm4, %v1789_v54, 0.0  ;;  %v989_v25 = vmul.f32 %v1795_v57, %v1795_v57 }
 0x213   : > { %v949_v28 = vadd.f32 %v948_v22, %v947_v19  ;;  %v1013_v5 = vsel %vm605_vm4, %v987_v35, 0.0  ;;  %v990_v10 = vmul.f32 %v1779_v48, %v1779_v48  ;;  %v1015_v51 = vsel %vm605_vm4, %v988_v27, 0.0 }
 0x214   : > { %v1004_v46 = vadd.f32 %v1003_v40, %v1002_v43  ;;  %v991_v13 = vmul.f32 %v1789_v54, %v1789_v54  ;;  %v1017_v14 = vsel %vm605_vm4, %v989_v25, 0.0  ;;  %vm973_vm10 = vcmask 57344  }
 0x215   : > { %v951_v33 = vadd.f32 %v950_v8, %v949_v28  ;;  %v1019_v57 = vsel %vm605_vm4, %v990_v10, 0.0  ;;  %v975_v28 = vld [vmem:[%s1669_s28] sm:$0x1] }
 0x216   : > { %v1006_v53 = vadd.f32 %v1005_v45, %v1004_v46  ;;  %v1021_v48 = vsel %vm605_vm4, %v991_v13, 0.0 }
 0x217   : > { %v953_v49 = vadd.f32 %v952_v47, %v951_v33 }
 0x218   : > { %v1008_v60 = vadd.f32 %v1007_v63, %v1006_v53 }
 0x219   : > { %v955_v44 = vadd.f32 %v954_v37, %v953_v49 }
 0x21a   : > { %v1010_v3 = vadd.f32 %v1009_v56, %v1008_v60 }
 0x21b   : > { %v957_v50 = vadd.f32 %v956_v41, %v955_v44 }
 0x21c   : > { %v1012_v7 = vadd.f32 %v1011_v62, %v1010_v3 }
 0x21d   : > { %v959_v55 = vadd.f32 %v958_v34, %v957_v50 }
 0x21e   : > { %v1014_v11 = vadd.f32 %v1013_v5, %v1012_v7 }
 0x21f   : > { %v961_v61 = vadd.f32 %v960_v52, %v959_v55 }
 0x220   : > { %v1016_v15 = vadd.f32 %v1015_v51, %v1014_v11 }
 0x221   : > { %v963_v4 = vadd.f32 %v962_v59, %v961_v61 }
 0x222   : > { %v1018_v17 = vadd.f32 %v1017_v14, %v1016_v15 }
 0x223   : > { %v965_v9 = vadd.f32 %v964_v1, %v963_v4 }
 0x224   : > { %v1020_v20 = vadd.f32 %v1019_v57, %v1018_v17 }
 0x225   : > { %v966_v12 = vrot.slane %v965_v9, 4 }
 0x226   : > { %v1022_v21 = vadd.f32 %v1021_v48, %v1020_v20 }
 0x227   : > { %v967_v16 = vadd.f32 %v966_v12, %v965_v9 }
 0x228   : > { %v1023_v24 = vrot.slane %v1022_v21, 4 }
 0x229   : > { %v968_v18 = vrot.slane %v967_v16, 2 }
 0x22a   : > { %v1024_v19 = vadd.f32 %v1023_v24, %v1022_v21 }
 0x22b   : > { %v969_v2 = vadd.f32 %v968_v18, %v967_v16 }
 0x22c   : > { %v1025_v6 = vrot.slane %v1024_v19, 2 }
 0x22d   : > { %v970_v22 = vrot.slane %v969_v2, 1 }
 0x22e   : > { %v1026_v8 = vadd.f32 %v1025_v6, %v1024_v19 }
 0x22f   : > { %v971_v54 = vadd.f32 %v970_v22, %v969_v2 }
 0x230   : > { %v1027_v26 = vrot.slane %v1026_v8, 1 }
 0x231   : > { %v972_v0 = vadd.f32 %v971_v54, %v934_v23 }
 0x232   : > { %v1028_v29 = vadd.f32 %v1027_v26, %v1026_v8 }
 0x233   : > { %974 = vst.msk [vmem:[%s1663_s25] sm:$0x1] %vm973_vm10, %v972_v0 }
 0x234   : > { %v1029_v31 = vadd.f32 %v1028_v29, %v975_v28 }
 0x236   : > { %1030 = vst.msk [vmem:[%s1669_s28] sm:$0x1] %vm973_vm10, %v1029_v31 }
 0x237 PF: > { %s16_s22 = sadd.s32 1, %s1399_s22   ;;  %s1911_s18 = smov %s1391_s20 }
 0x238   : > { %p13_p9 = scmp.ge.s32.totalorder %s16_s22, 6   ;;  %s1912_s19 = smov %s1395_s21 }
 0x239   : > { %s1913_s20 = smov %s1916_s23  ;;  %s1914_s21 = smov %s1920_s24 }
 0x23a   :  { %15 = sbr.rel (!%p13_p9) target bundleno = 3 (0x3), region = 90 }

// kernel: double_conv_sn_forward.5
= control target key start
LH: loop header
LB: loop body
LE: loop exit
PB: predicated region body
PF: predicated region fallthrough
CT: control target
= control target key end

     0   :  { %s456_s12 = smov 0   ;;  %s458_s13 = smov 0   ;;  %s492_s0 = inlined_call_operand.vmem [shape: bf16[2,16,128], index: 0, kind: input, shape index: {}]   ;;  %s493_s1 = inlined_call_operand.vmem [shape: f32[2,1,128], index: 1, kind: input, shape index: {}]   ;;  %s494_s2 = inlined_call_operand.vmem [shape: f32[2,1,128], index: 2, kind: input, shape index: {}]   ;;  %s495_s3 = inlined_call_operand.vmem [shape: f32[2,16,128], index: 3, kind: output, shape index: {}]  }
   0x1   :  { %s460_s14 = smov 0  }
   0x2 LB: > { %s25_s15 = sadd.s32 1, %s430_s13  ;;  %p373_p0 = scmp.ge.s32.totalorder %s434_s14, 1  ;;  %s434_s14 = sphi %s460_s14, %s13_s14   ;;  %s430_s13 = sphi %s458_s13, %s497_s13   ;;  %s426_s12 = sphi %s456_s12, %s496_s12  }
   0x3   : > { %p27_p1 = scmp.ge.s32.totalorder %s25_s15, 2  ;;  %p174_p2 = scmp.lt.s32.totalorder %s434_s14, 3 }
   0x5   : > { %s499_s15 = smov (%p27_p1, %s25_s15), 0  ;;  %p175_p3 = pnand %p373_p0, %p174_p2 }
   0x6   : > { %p213_p4 = scmp.lt.s32.totalorder (!%p175_p3), %s426_s12, 1 }
   0x7   : > { %178 = sbr.rel (%p175_p3) target bundleno = 27 (0x1b), region = 32 }
   0xe   : > { %s501_s12 = smov (!%p213_p4, %s426_s12), 1 }
   0xf   : > { %s382_s16 = sshll.u32 %s501_s12, 3  ;;  %s224_s19 = scalar_lea.vmem %s493_s1, %s501_s12 }
  0x10   : > { %s220_s22 = scalar_lea.vmem %s492_s0, %s382_s16  ;;  %s227_s25 = scalar_lea.vmem %s494_s2, %s501_s12  ;;  %v378_v1 = vld [vmem:[%s224_s19] ss:$0 sm:$0xff] }
  0x11   : > { %v385_v0 = vld [vmem:[%s220_s22] sm:$0xff]   ;;  %s383_s26 = sshll.u32 %s501_s12, 4 }
  0x12   : > { %v386_v2 = vunpack.c.l.bf16 %v385_v0  ;;  %v387_v3 = vunpack.c.h.bf16 %v385_v0  ;;  %v379_v4 = vld [vmem:[%s227_s25] ss:$0 sm:$0xff]  ;;  %s236_s29 = scalar_lea.vmem %s495_s3, %s383_s26 }
  0x14   : > { %v249_v5 = vmul.f32 %v386_v2, %v378_v1  ;;  %v250_v6 = vmul.f32 %v387_v3, %v378_v1 }
  0x16   : > { %v258_v7 = vadd.f32 %v379_v4, %v249_v5  ;;  %v259_v8 = vadd.f32 %v379_v4, %v250_v6 }
  0x18   : > { %v260_v9 = vmax.f32 %v258_v7, 0.0  ;;  %v261_v10 = vmax.f32 %v259_v8, 0.0 }
  0x1a   : > { %262 = vst [vmem:[%s236_s29] sm:$0xff] %v260_v9  ;;  %263 = vst [vmem:[%s236_s29 + $0x8] sm:$0xff] %v261_v10 }
  0x1b PF: > { %s13_s14 = sadd.s32 1, %s434_s14   ;;  %s496_s12 = smov %s430_s13 }
  0x1c   : > { %p10_p5 = scmp.ge.s32.totalorder %s13_s14, 4   ;;  %s497_s13 = smov %s499_s15 }
  0x1e   :  { %12 = sbr.rel (!%p10_p5) target bundleno = 2 (0x2), region = 68 }

// kernel: double_conv_sn_forward.4
= control target key start
LH: loop header
LB: loop body
LE: loop exit
PB: predicated region body
PF: predicated region fallthrough
CT: control target
= control target key end

     0   :  { %s1798_s24 = smov 0   ;;  %s1800_s25 = smov 0   ;;  %s2567_s0 = inlined_call_operand.vmem [shape: bf16[4,10,18,8], index: 0, kind: input, shape index: {}]   ;;  %s2568_s1 = inlined_call_operand.vmem [shape: f32[2,1,8], index: 1, kind: input, shape index: {}]   ;;  %s2569_s2 = inlined_call_operand.vmem [shape: f32[2,1,8], index: 2, kind: input, shape index: {}]   ;;  %s2570_s3 = inlined_call_operand.vmem [shape: bf16[72,8], index: 3, kind: input, shape index: {}]   ;;  %s2571_s4 = inlined_call_operand.vmem [shape: f32[1,8], index: 4, kind: input, shape index: {}]   ;;  %s2572_s5 = inlined_call_operand.vmem [shape: bf16[2,16,16,8], index: 5, kind: output, shape index: {0}]   ;;  %s2573_s6 = inlined_call_operand.vmem [shape: f32[2,1,8], index: 6, kind: output, shape index: {1}]   ;;  %s2574_s7 = inlined_call_operand.vmem [shape: f32[2,1,8], index: 7, kind: output, shape index: {2}]  }
   0x1   :  { %s1802_s26 = smov 0   ;;  %s1804_s27 = smov 0  }
   0x2   :  { %s1806_s28 = smov 0  }
   0x3 LB: > { %s27_s29 = sadd.s32 1, %s1743_s26  ;;  %s30_s30 = sadd.s32 1, %s1747_s27  ;;  %s1751_s28 = sphi %s1806_s28, %s18_s28   ;;  %s1747_s27 = sphi %s1804_s27, %s2608_s27   ;;  %s1743_s26 = sphi %s1802_s26, %s2607_s26   ;;  %s1739_s25 = sphi %s1800_s25, %s2606_s25   ;;  %s1735_s24 = sphi %s1798_s24, %s2605_s24  }
   0x4   : > { %p28_p0 = scmp.ge.s32.totalorder %s27_s29, 2  ;;  %p1528_p1 = scmp.ge.s32.totalorder %s1751_s28, 1 }
   0x5   : > { %p280_p2 = scmp.lt.s32.totalorder %s1751_s28, 5 }
   0x6   : > { %s2610_s29 = smov (%p28_p0, %s27_s29), 0  ;;  %s2612_s30 = smov (!%p28_p0, %s30_s30), %s1747_s27 }
   0x7   : > { %p281_p3 = pnand %p1528_p1, %p280_p2  ;;  %p32_p4 = scmp.ge.s32.totalorder %s2612_s30, 2 }
   0x8   : > { %s1529_s8 = sshll.u32 (!%p281_p3), %s1739_s25, 1  ;;  %p340_p5 = scmp.lt.s32.totalorder (!%p281_p3), %s1739_s25, 1  ;;  %v539_v0 = vlaneseq (!%p281_p3)  ;;  %vm850_vm11 = vcmask (!%p281_p3), 1046528  }
   0x9   : > { %s2614_s30 = smov (%p32_p4, %s2612_s30), 0  ;;  %284 = sbr.rel (%p281_p3) target bundleno = 606 (0x25e), region = 40 }
   0xa   : > { %s332_s9 = sadd.s32 (!%p281_p3), %s1735_s24, %s1529_s8  ;;  %s1531_s10 = sshll.u32 (!%p281_p3), %s1735_s24, 3  ;;  %v1834_v2 = vshrl.u32 (!%p281_p3), %v539_v0, 7 }
   0xb   : > { %p333_p6 = scmp.lt.s32.totalorder (!%p281_p3), %s332_s9, 3  ;;  %p349_p7 = scmp.lt.s32.totalorder (!%p281_p3), %s1531_s10, 15  ;;  %v1832_v1 = vstv (!%p281_p3), %s1531_s10 }
   0xc   : > { %v534_v3 = vadd.s32 (!%p281_p3), 5, %v1832_v1  ;;  %v530_v4 = vadd.s32 (!%p281_p3), 1, %v1832_v1  ;;  %v1841_v5 = vadd.s32 (!%p281_p3), 16, %v1834_v2  ;;  %v1844_v6 = vadd.s32 (!%p281_p3), 6, %v1832_v1  ;;  %s1756_s15 = smov (!%p281_p3), 48   ;;  %p1568_p8 = scmp.ne.s32.totalorder (!%p281_p3), %s1735_s24, 0 }
   0xd   : > { %vm573_vm2 = vcmp.ge.s32.totalorder (!%p281_p3), %v1834_v2, 1  ;;  %v1857_v7 = vadd.s32 (!%p281_p3), 2, %v1832_v1  ;;  %v1861_v8 = vadd.s32 (!%p281_p3), 7, %v1832_v1  ;;  %v1864_v9 = vadd.s32 (!%p281_p3), 3, %v1832_v1 }
   0xe   : > { %vm548_vm0 = vcmp.ge.s32.totalorder (!%p281_p3), %v534_v3, 1  ;;  %vm558_vm1 = vcmp.le.s32.totalorder (!%p281_p3), %v534_v3, 16  ;;  %vm544_vm3 = vcmp.ge.s32.totalorder (!%p281_p3), %v530_v4, 1  ;;  %vm554_vm4 = vcmp.le.s32.totalorder (!%p281_p3), %v530_v4, 16 }
   0xf   : > { %vm1879_vm5 = vmand (!%p281_p3), %vm548_vm0, %vm558_vm1  ;;  %vm608_vm6 = vcmp.le.s32.totalorder (!%p281_p3), %v1841_v5, 16  ;;  %vm549_vm7 = vcmp.ge.s32.totalorder (!%p281_p3), %v1844_v6, 1  ;;  %vm559_vm8 = vcmp.le.s32.totalorder (!%p281_p3), %v1844_v6, 16  ;;  %vm545_vm12 = vcmp.ge.s32.totalorder (!%p281_p3), %v1857_v7, 1 }
  0x10   : > { %s2616_s25 = smov (!%p340_p5, %s1739_s25), 1  ;;  %s2618_s9 = smov (!%p333_p6, %s332_s9), 3  ;;  %vm1908_vm9 = vmand %vm544_vm3, %vm554_vm4  ;;  %vm555_vm13 = vcmp.le.s32.totalorder %v1857_v7, 16  ;;  %vm550_vm3 = vcmp.ge.s32.totalorder %v1861_v8, 1  ;;  %vm560_vm4 = vcmp.le.s32.totalorder %v1861_v8, 16 }
  0x11   : > { %s342_s13 = scalar_lea.vmem %s2568_s1, %s2616_s25  ;;  %s345_s16 = scalar_lea.vmem %s2569_s2, %s2616_s25  ;;  %vm1920_vm10 = vmand %vm1879_vm5, %vm573_vm2 }
  0x12   : > { %s1662_s17 = smul.u32 120, %s2618_s9  ;;  %s1533_s18 = sshll.u32 %s2616_s25, 5  ;;  %v1877_v10 = vld [vmem:[%s342_s13] ss:$0 sm:$0xff]  ;;  %vm1931_vm14 = vmand %vm1879_vm5, %vm608_vm6 }
  0x13   : > { %s2620_s10 = smov (!%p349_p7, %s1531_s10), 15  ;;  %s1875_s8 = scalar_lea.vmem %s2573_s6, %s2616_s25  ;;  %v1904_v21 = vld [vmem:[%s345_s16] ss:$0 sm:$0xff]  ;;  %vm1946_vm15 = vmand %vm1908_vm9, %vm573_vm2 }
  0x14   : > { %s1869_s21 = scalar_lea.vmem %s2567_s0, %s1662_s17  ;;  %s1532_s9 = sshll.u32 %s2620_s10, 1  ;;  %vm1956_vm0 = vmand %vm1908_vm9, %vm608_vm6 }
  0x15   : > { %s1889_s14 = scalar_lea.vmem %s2574_s7, %s2616_s25  ;;  %v379_v12 = vld [vmem:[%s1869_s21 + $0x3c] sm:$0xff]   ;;  %v381_v13 = vld [vmem:[%s1869_s21 + $0x44] sm:$0x1]  ;;  %v367_v14 = vld [vmem:[%s1869_s21 + $0xc] sm:$0xff]   ;;  %s1895_s13 = sadd.s32 %s1533_s18, %s1532_s9 }
  0x16   : > { %v409_v15 = vunpack.c.l.bf16 %v379_v12  ;;  %v410_v16 = vunpack.c.h.bf16 %v379_v12  ;;  %v411_v17 = vunpack.c.l.bf16 %v381_v13  ;;  %v369_v18 = vld [vmem:[%s1869_s21 + $0x14] sm:$0x1]  ;;  %v397_v19 = vunpack.c.l.bf16 %v367_v14  ;;  %v1609_v20 = vld [vmem:[%s1869_s21 + $0x48] sm:$0xff]   ;;  %v384_v27 = vld [vmem:[%s1869_s21 + $0x50] sm:$0x1]  ;;  %s1753_s25 = smov 16  }
  0x17   : > { %v398_v22 = vunpack.c.h.bf16 %v367_v14  ;;  %v399_v23 = vunpack.c.l.bf16 %v369_v18  ;;  %v1601_v25 = vunpack.c.l.bf16 %v1609_v20  ;;  %v1602_v26 = vunpack.c.h.bf16 %v1609_v20  ;;  %vm1966_vm1 = vmand %vm549_vm7, %vm559_vm8  ;;  %v1607_v57 = vld [vmem:[%s1869_s21 + $0x18] sm:$0xff]   ;;  %v372_v13 = vld [vmem:[%s1869_s21 + $0x20] sm:$0x1]  ;;  %s1754_s16 = smov 8   ;;  %s1755_s10 = smov 24  }
  0x18   : > { %v446_v28 = vmul.f32 %v1877_v10, %v409_v15  ;;  %v447_v29 = vmul.f32 %v1877_v10, %v410_v16  ;;  %v448_v30 = vmul.f32 %v1877_v10, %v411_v17  ;;  %v434_v32 = vmul.f32 %v1877_v10, %v397_v19  ;;  %vm2007_vm7 = vmand %vm1966_vm1, %vm608_vm6  ;;  %v385_v24 = vld [vmem:[%s1869_s21 + $0x54] sm:$0xff]   ;;  %s1534_s17 = sshll.u32 %s1895_s13, 2 }
  0x19   : > { %v435_v34 = vmul.f32 %v1877_v10, %v398_v22  ;;  %v436_v35 = vmul.f32 %v1877_v10, %v399_v23  ;;  %v414_v36 = vunpack.c.l.bf16 %v384_v27  ;;  %v449_v37 = vmul.f32 %v1601_v25, %v1877_v10  ;;  %s2383_s20 = scalar_lea.vmem %s2572_s5, %s1534_s17 }
  0x1a   : > { %v483_v38 = vadd.f32 %v1904_v21, %v446_v28  ;;  %v484_v39 = vadd.f32 %v1904_v21, %v447_v29  ;;  %v485_v40 = vadd.f32 %v1904_v21, %v448_v30  ;;  %v471_v41 = vadd.f32 %v1904_v21, %v434_v32  ;;  %v387_v30 = vld [vmem:[%s1869_s21 + $0x5c] sm:$0x1] }
  0x1b   : > { %v472_v43 = vadd.f32 %v1904_v21, %v435_v34  ;;  %v473_v44 = vadd.f32 %v1904_v21, %v436_v35  ;;  %v450_v46 = vmul.f32 %v1602_v26, %v1877_v10  ;;  %v451_v47 = vmul.f32 %v1877_v10, %v414_v36 }
  0x1c   : > { %v513_v48 = vmax.f32 %v483_v38, 0.0  ;;  %v514_v49 = vmax.f32 %v484_v39, 0.0  ;;  %v515_v50 = vmax.f32 %v485_v40, 0.0  ;;  %v501_v51 = vmax.f32 %v471_v41, 0.0  ;;  %v373_v38 = vld [vmem:[%s1869_s21 + $0x24] sm:$0xff]  }
  0x1d   : > { %v502_v53 = vmax.f32 %v472_v43, 0.0  ;;  %v503_v54 = vmax.f32 %v473_v44, 0.0  ;;  %v486_v55 = vadd.f32 %v1904_v21, %v449_v37  ;;  %v487_v56 = vadd.f32 %v1904_v21, %v450_v46 }
  0x1e   : > { %v654_v58 = vsel %vm1920_vm10, %v513_v48, 0.0  ;;  %v655_v59 = vsel %vm1879_vm5, %v514_v49, 0.0  ;;  %v656_v60 = vsel %vm1931_vm14, %v515_v50, 0.0  ;;  %v642_v61 = vsel %vm1946_vm15, %v501_v51, 0.0  ;;  %vm594_vm5 = vmand %vm1966_vm1, %vm573_vm2 }
  0x1f   : > { %v1983_v62 = vpack.c.bf16 %v655_v59, %v654_v58  ;;  %v1985_v63 = vpack.c.bf16 %v656_v60, %v656_v60  ;;  %v643_v0 = vsel %vm1908_vm9, %v502_v53, 0.0  ;;  %v644_v3 = vsel %vm1956_vm0, %v503_v54, 0.0  ;;  %vm2023_vm10 = vmand %vm545_vm12, %vm555_vm13  ;;  %v375_v53 = vld [vmem:[%s1869_s21 + $0x2c] sm:$0x1] }
  0x20   : > { %v1995_v4 = vpack.c.bf16 %v643_v0, %v642_v61  ;;  %v1997_v6 = vpack.c.bf16 %v644_v3, %v644_v3  ;;  %v488_v11 = vadd.f32 %v1904_v21, %v451_v47  ;;  %v516_v12 = vmax.f32 %v486_v55, 0.0  ;;  %vm2047_vm12 = vmand %vm2023_vm10, %vm573_vm2 }
  0x21   : > { %v866_v14 = vrot.slane %v1983_v62, 1  ;;  %v867_v15 = vrot.slane %v1985_v63, 1  ;;  %v517_v16 = vmax.f32 %v487_v56, 0.0  ;;  %v1593_v18 = vunpack.c.l.bf16 %v1607_v57  ;;  %vm2059_vm13 = vmand %vm550_vm3, %vm560_vm4 }
  0x22   : > { %v854_v19 = vrot.slane %v1995_v4, 1  ;;  %v855_v20 = vrot.slane %v1997_v6, 1  ;;  %v518_v22 = vmax.f32 %v488_v11, 0.0  ;;  %v657_v23 = vsel %vm594_vm5, %v516_v12, 0.0  ;;  %vm2067_vm14 = vmand %vm2023_vm10, %vm608_vm6 }
  0x23   : > { %vm546_vm8 = vcmp.ge.s32.totalorder %v1864_v9, 1  ;;  %vm556_vm9 = vcmp.le.s32.totalorder %v1864_v9, 16  ;;  %v868_v25 = vsel %vm850_vm11, %v866_v14, %v867_v15  ;;  %v658_v26 = vsel %vm1966_vm1, %v517_v16, 0.0  ;;  %vm597_vm15 = vmand %vm2059_vm13, %vm573_vm2 }
  0x24   : > { %v1594_v27 = vunpack.c.h.bf16 %v1607_v57  ;;  %v402_v28 = vunpack.c.l.bf16 %v372_v13  ;;  %891 = vrot.lane.b32.xlu1 %v868_v25, %s1753_s25  ;;  %v856_v31 = vsel %vm850_vm11, %v854_v19, %v855_v20  ;;  %v659_v32 = vsel %vm2007_vm7, %v518_v22, 0.0  ;;  %vm632_vm0 = vmand %vm2059_vm13, %vm608_vm6 }
  0x25   : > { %v2032_v33 = vpack.c.bf16 %v658_v26, %v657_v23  ;;  %v437_v34 = vmul.f32 %v1593_v18, %v1877_v10  ;;  %883 = vrot.lane.b32.xlu0 %v856_v31, %s1753_s25  ;;  %v2036_v7 = vpack.c.bf16 %v659_v32, %v659_v32  ;;  %v415_v37 = vunpack.c.l.bf16 %v385_v24  ;;  %vm2102_vm3 = vmand %vm546_vm8, %vm556_vm9 }
  0x26   : > { %v438_v35 = vmul.f32 %v1594_v27, %v1877_v10  ;;  %v439_v36 = vmul.f32 %v1877_v10, %v402_v28  ;;  %v416_v42 = vunpack.c.h.bf16 %v385_v24  ;;  %v417_v43 = vunpack.c.l.bf16 %v387_v30  ;;  %vm585_vm4 = vmand %vm2102_vm3, %vm573_vm2 }
  0x27   : > { %v869_v39 = vrot.slane %v2032_v33, 1  ;;  %v474_v40 = vadd.f32 %v1904_v21, %v437_v34  ;;  %v870_v44 = vrot.slane %v2036_v7, 1  ;;  %v452_v47 = vmul.f32 %v1877_v10, %v415_v37  ;;  %vm620_vm5 = vmand %vm2102_vm3, %vm608_vm6 }
  0x28   : > { %v475_v45 = vadd.f32 %v1904_v21, %v438_v35  ;;  %v476_v46 = vadd.f32 %v1904_v21, %v439_v36  ;;  %v453_v51 = vmul.f32 %v1877_v10, %v416_v42  ;;  %v454_v52 = vmul.f32 %v1877_v10, %v417_v43 }
  0x29   : > { %v504_v49 = vmax.f32 %v474_v40, 0.0  ;;  %v403_v54 = vunpack.c.l.bf16 %v373_v38  ;;  %v871_v8 = vsel %vm850_vm11, %v869_v39, %v870_v44  ;;  %v489_v57 = vadd.f32 %v1904_v21, %v452_v47 }
  0x2a   : > { %v505_v55 = vmax.f32 %v475_v45, 0.0  ;;  %v506_v56 = vmax.f32 %v476_v46, 0.0  ;;  %893 = vrot.lane.b32.xlu1 %v871_v8, %s1753_s25  ;;  %v490_v59 = vadd.f32 %v1904_v21, %v453_v51  ;;  %v491_v60 = vadd.f32 %v1904_v21, %v454_v52 }
  0x2b   : > { %v645_v58 = vsel %vm2047_vm12, %v504_v49, 0.0  ;;  %v404_v61 = vunpack.c.h.bf16 %v373_v38  ;;  %v519_v11 = vmax.f32 %v489_v57, 0.0  ;;  %v405_v12 = vunpack.c.l.bf16 %v375_v53 }
  0x2c   : > { %v646_v0 = vsel %vm2023_vm10, %v505_v55, 0.0  ;;  %v647_v3 = vsel %vm2067_vm14, %v506_v56, 0.0  ;;  %vm689_vm1 = vsmask.f32 7424  ;;  %v520_v15 = vmax.f32 %v490_v59, 0.0 }
  0x2d   : > { %v2093_v13 = vpack.c.bf16 %v646_v0, %v645_v58  ;;  %v674_v14 = vpack.c.bf16 %v647_v3, %v647_v3  ;;  %v521_v16 = vmax.f32 %v491_v60, 0.0  ;;  %v660_v17 = vsel %vm597_vm15, %v519_v11, 0.0 }
  0x2e   : > { %v440_v18 = vmul.f32 %v1877_v10, %v403_v54  ;;  %v441_v19 = vmul.f32 %v1877_v10, %v404_v61  ;;  %v442_v20 = vmul.f32 %v1877_v10, %v405_v12  ;;  %v661_v25 = vsel %vm2059_vm13, %v520_v15, 0.0 }
  0x2f   : > { %v857_v23 = vrot.slane %v2093_v13, 1  ;;  %v858_v24 = vrot.slane %v674_v14, 1  ;;  %v662_v26 = vsel %vm632_vm0, %v521_v16, 0.0  ;;  %v2109_v27 = vpack.c.bf16 %v661_v25, %v660_v17  ;;  %v1608_v16 = vld [vmem:[%s1869_s21 + $0x30] sm:$0xff]   ;;  %v378_v25 = vld [vmem:[%s1869_s21 + $0x38] sm:$0x1] }
  0x30   : > { %v684_v28 = vpack.c.bf16 %v662_v26, %v662_v26  ;;  %v477_v29 = vadd.f32 %v1904_v21, %v440_v18  ;;  %v478_v30 = vadd.f32 %v1904_v21, %v441_v19  ;;  %v479_v31 = vadd.f32 %v1904_v21, %v442_v20 }
  0x31   : > { %v859_v9 = vsel %vm850_vm11, %v857_v23, %v858_v24  ;;  %v715_v32 = vshrl.u32 %v2093_v13, 16  ;;  %v717_v34 = vshll.u32 %v2093_v13, 16  ;;  %v872_v35 = vrot.slane %v2109_v27, 1 }
  0x32   : > { %885 = vrot.lane.b32.xlu0 %v859_v9, %s1753_s25  ;;  %v873_v36 = vrot.slane %v684_v28, 1  ;;  %v507_v37 = vmax.f32 %v477_v29, 0.0  ;;  %v508_v38 = vmax.f32 %v478_v30, 0.0  ;;  %v509_v39 = vmax.f32 %v479_v31, 0.0  ;;  %v1610_v31 = vld [vmem:[%s1869_s21 + $0x60] sm:$0xff]  }
  0x33   : > { %v719_v40 = vrot.slane %v717_v34, 1  ;;  %v722_v41 = vshll.u32 %v674_v14, 16  ;;  %v703_v42 = vshrl.u32 %v1995_v4, 16  ;;  %v705_v46 = vshll.u32 %v1995_v4, 16 }
  0x34   : > { %v874_v43 = vsel %vm850_vm11, %v872_v35, %v873_v36  ;;  %v648_v44 = vsel %vm585_vm4, %v507_v37, 0.0  ;;  %v649_v45 = vsel %vm2102_vm3, %v508_v38, 0.0  ;;  %v650_v47 = vsel %vm620_vm5, %v509_v39, 0.0 }
  0x35   : > { %895 = vrot.lane.b32.xlu1 %v874_v43, %s1753_s25  ;;  %v2133_v48 = vpack.c.bf16 %v649_v45, %v648_v44  ;;  %v720_v49 = vor.u32 %v719_v40, %v715_v32  ;;  %v724_v50 = vrot.slane %v722_v41, 1  ;;  %v676_v51 = vpack.c.bf16 %v650_v47, %v650_v47  ;;  %v390_v40 = vld [vmem:[%s1869_s21 + $0x68] sm:$0x1]  ;;  %v391_v47 = vld [vmem:[%s1869_s21 + $0x6c] sm:$0xff]  }
  0x36   : > { %v707_v52 = vrot.slane %v705_v46, 1  ;;  %v710_v53 = vshll.u32 %v1997_v6, 16  ;;  %v763_v54 = vshrl.u32 %v2032_v33, 16  ;;  %v765_v56 = vshll.u32 %v2032_v33, 16 }
  0x37   : > { %v860_v8 = vrot.slane %v2133_v48, 1  ;;  %v725_v55 = vsel %vm689_vm1, %v720_v49, %v724_v50  ;;  %v770_v57 = vshll.u32 %v2036_v7, 16  ;;  %v861_v58 = vrot.slane %v676_v51, 1 }
  0x38   : > { %v708_v59 = vor.u32 %v707_v52, %v703_v42  ;;  %v712_v60 = vrot.slane %v710_v53, 1  ;;  %v751_v61 = vshrl.u32 %v1983_v62, 16  ;;  %v767_v6 = vrot.slane %v765_v56, 1 }
  0x39   : > { %814 = vrot.lane.b32.xlu1 %v725_v55, %s1754_s16  ;;  %v772_v0 = vrot.slane %v770_v57, 1  ;;  %v753_v3 = vshll.u32 %v1983_v62, 16  ;;  %v758_v11 = vshll.u32 %v1985_v63, 16  ;;  %v862_v12 = vsel %vm850_vm11, %v860_v8, %v861_v58 }
  0x3a   : > { %v713_v14 = vsel %vm689_vm1, %v708_v59, %v712_v60  ;;  %v775_v7 = vshrl.u32 %v2109_v27, 16  ;;  %v777_v15 = vshll.u32 %v2109_v27, 16  ;;  %887 = vrot.lane.b32.xlu0 %v862_v12, %s1753_s25  ;;  %v768_v17 = vor.u32 %v767_v6, %v763_v54 }
  0x3b   : > { %v755_v18 = vrot.slane %v753_v3, 1  ;;  %v760_v19 = vrot.slane %v758_v11, 1  ;;  %v782_v20 = vshll.u32 %v684_v28, 16  ;;  %v727_v23 = vshrl.u32 %v2133_v48, 16  ;;  %v393_v3 = vld [vmem:[%s1869_s21 + $0x74] sm:$0x1] }
  0x3c   : > { %v779_v22 = vrot.slane %v777_v15, 1  ;;  %v729_v63 = vshll.u32 %v2133_v48, 16  ;;  %v734_v24 = vshll.u32 %v676_v51, 16  ;;  %v773_v26 = vsel %vm689_vm1, %v768_v17, %v772_v0 }
  0x3d   : > { %v756_v29 = vor.u32 %v755_v18, %v751_v61  ;;  %v784_v30 = vrot.slane %v782_v20, 1  ;;  %v1597_v9 = vunpack.c.l.bf16 %v1608_v16  ;;  %822 = vrot.lane.b32.xlu1 %v773_v26, %s1754_s16  ;;  %v1598_v28 = vunpack.c.h.bf16 %v1608_v16 }
  0x3e   : > { %v780_v32 = vor.u32 %v779_v22, %v775_v7  ;;  %v731_v34 = vrot.slane %v729_v63, 1  ;;  %v736_v35 = vrot.slane %v734_v24, 1  ;;  %812 = vrot.lane.b32.xlu0 %v713_v14, %s1754_s16  ;;  %v408_v37 = vunpack.c.l.bf16 %v378_v25 }
  0x3f   : > { %v761_v36 = vsel %vm689_vm1, %v756_v29, %v760_v19  ;;  %v443_v38 = vmul.f32 %v1597_v9, %v1877_v10  ;;  %v533_v39 = vadd.s32 4, %v1832_v1  ;;  %v444_v43 = vmul.f32 %v1598_v28, %v1877_v10 }
  0x40   : > { %v785_v41 = vsel %vm689_vm1, %v780_v32, %v784_v30  ;;  %v732_v42 = vor.u32 %v731_v34, %v727_v23  ;;  %v1605_v44 = vunpack.c.l.bf16 %v1610_v31  ;;  %v445_v45 = vmul.f32 %v1877_v10, %v408_v37 }
  0x41   : > { %v480_v46 = vadd.f32 %v1904_v21, %v443_v38  ;;  %vm547_vm7 = vcmp.ge.s32.totalorder %v533_v39, 1  ;;  %vm557_vm8 = vcmp.le.s32.totalorder %v533_v39, 16  ;;  %824 = vrot.lane.b32.xlu1 %v785_v41, %s1754_s16  ;;  %v481_v50 = vadd.f32 %v1904_v21, %v444_v43 }
  0x42   : > { %v737_v49 = vsel %vm689_vm1, %v732_v42, %v736_v35  ;;  %vm2170_vm9 = vmand %vm547_vm7, %vm557_vm8  ;;  %v1606_v52 = vunpack.c.h.bf16 %v1610_v31  ;;  %v420_v53 = vunpack.c.l.bf16 %v390_v40  ;;  %820 = vrot.lane.b32.xlu0 %v761_v36, %s1754_s16  ;;  %v482_v54 = vadd.f32 %v1904_v21, %v445_v45 }
  0x43   : > { %v510_v8 = vmax.f32 %v480_v46, 0.0  ;;  %vm588_vm10 = vmand %vm2170_vm9, %vm573_vm2  ;;  %v455_v55 = vmul.f32 %v1605_v44, %v1877_v10  ;;  %v537_v56 = vadd.s32 8, %v1832_v1  ;;  %v511_v57 = vmax.f32 %v481_v50, 0.0 }
  0x44   : > { %vm623_vm12 = vmand %vm2170_vm9, %vm608_vm6  ;;  %v456_v58 = vmul.f32 %v1606_v52, %v1877_v10  ;;  %v457_v59 = vmul.f32 %v1877_v10, %v420_v53  ;;  %v421_v60 = vunpack.c.l.bf16 %v391_v47  ;;  %v512_v61 = vmax.f32 %v482_v54, 0.0  ;;  %v366_v52 = vld [vmem:[%s1869_s21 + $0x8] sm:$0x1] }
  0x45   : > { %v651_v6 = vsel %vm588_vm10, %v510_v8, 0.0  ;;  %v492_v0 = vadd.f32 %v1904_v21, %v455_v55  ;;  %vm551_vm13 = vcmp.ge.s32.totalorder %v537_v56, 1  ;;  %v652_v11 = vsel %vm2170_vm9, %v511_v57, 0.0 }
  0x46   : > { %v493_v12 = vadd.f32 %v1904_v21, %v456_v58  ;;  %v494_v14 = vadd.f32 %v1904_v21, %v457_v59  ;;  %vm561_vm14 = vcmp.le.s32.totalorder %v537_v56, 16  ;;  %816 = vrot.lane.b32.xlu0 %v737_v49, %s1754_s16  ;;  %v653_v7 = vsel %vm623_vm12, %v512_v61, 0.0 }
  0x47   : > { %v2195_v15 = vpack.c.bf16 %v652_v11, %v651_v6  ;;  %v522_v16 = vmax.f32 %v492_v0, 0.0  ;;  %vm571_vm15 = vmand %vm551_vm13, %vm561_vm14  ;;  %v422_v17 = vunpack.c.h.bf16 %v391_v47  ;;  %v678_v18 = vpack.c.bf16 %v653_v7, %v653_v7  ;;  %v1588_v47 = vld [vmem:[%s1869_s21] sm:$0xff]  }
  0x48   : > { %v523_v19 = vmax.f32 %v493_v12, 0.0  ;;  %v524_v20 = vmax.f32 %v494_v14, 0.0  ;;  %vm600_vm0 = vmand %vm571_vm15, %vm573_vm2  ;;  %v423_v22 = vunpack.c.l.bf16 %v393_v3  ;;  %v458_v35 = vmul.f32 %v1877_v10, %v421_v60 }
  0x49   : > { %v863_v23 = vrot.slane %v2195_v15, 1  ;;  %v739_v63 = vshrl.u32 %v2195_v15, 16  ;;  %v741_v24 = vshll.u32 %v2195_v15, 16  ;;  %vm635_vm3 = vmand %vm571_vm15, %vm608_vm6  ;;  %v663_v25 = vsel %vm600_vm0, %v522_v16, 0.0 }
  0x4a   : > { %v864_v26 = vrot.slane %v678_v18, 1  ;;  %v746_v29 = vshll.u32 %v678_v18, 16  ;;  %v664_v30 = vsel %vm571_vm15, %v523_v19, 0.0  ;;  %v665_v9 = vsel %vm635_vm3, %v524_v20, 0.0 }
  0x4b   : > { %v743_v31 = vrot.slane %v741_v24, 1  ;;  %v2204_v32 = vpack.c.bf16 %v664_v30, %v663_v25  ;;  %v2206_v34 = vpack.c.bf16 %v665_v9, %v665_v9  ;;  %v459_v37 = vmul.f32 %v1877_v10, %v422_v17 }
  0x4c   : > { %v865_v28 = vsel %vm850_vm11, %v863_v23, %v864_v26  ;;  %v748_v36 = vrot.slane %v746_v29, 1  ;;  %v460_v38 = vmul.f32 %v1877_v10, %v423_v22  ;;  %v495_v43 = vadd.f32 %v1904_v21, %v458_v35 }
  0x4d   : > { %889 = vrot.lane.b32.xlu1 %v865_v28, %s1753_s25  ;;  %v744_v39 = vor.u32 %v743_v31, %v739_v63  ;;  %v787_v40 = vshrl.u32 %v2204_v32, 16  ;;  %v789_v41 = vshll.u32 %v2204_v32, 16  ;;  %v794_v42 = vshll.u32 %v2206_v34, 16 }
  0x4e   : > { %v496_v44 = vadd.f32 %v1904_v21, %v459_v37  ;;  %v497_v45 = vadd.f32 %v1904_v21, %v460_v38  ;;  %v538_v46 = vadd.s32 9, %v1832_v1  ;;  %v525_v53 = vmax.f32 %v495_v43, 0.0 }
  0x4f   : > { %v749_v49 = vsel %vm689_vm1, %v744_v39, %v748_v36  ;;  %v791_v50 = vrot.slane %v789_v41, 1  ;;  %v796_v51 = vrot.slane %v794_v42, 1  ;;  %v1589_v56 = vunpack.c.l.bf16 %v1588_v47  ;;  %v1708_v42 = vld [vmem:[%s2570_s3] sm:$0xff]  }
  0x50   : > { %818 = vrot.lane.b32.xlu0 %v749_v49, %s1754_s16  ;;  %v526_v54 = vmax.f32 %v496_v44, 0.0  ;;  %vm552_vm4 = vcmp.ge.s32.totalorder %v538_v46, 1  ;;  %v527_v55 = vmax.f32 %v497_v45, 0.0  ;;  %vm562_vm5 = vcmp.le.s32.totalorder %v538_v46, 16  ;;  %1624 = vmatprep.subr.bf16.mxu0 %v1708_v42 }
  0x51   : > { %v792_v8 = vor.u32 %v791_v50, %v787_v40  ;;  %vm572_vm7 = vmand %vm552_vm4, %vm562_vm5  ;;  %v1590_v57 = vunpack.c.h.bf16 %v1588_v47  ;;  %v396_v58 = vunpack.c.l.bf16 %v366_v52  ;;  %vm543_vm8 = vcmp.ge.s32.totalorder %v1832_v1, 1  ;;  %1650 = vmatprep.subr.bf16.mxu1 %v1708_v42  ;;  %1625 = vmatpush3.bf16.msra.mxu0 %v1708_v42 }
  0x52   : > { %vm553_vm9 = vcmp.le.s32.totalorder %v1832_v1, 16  ;;  %vm603_vm10 = vmand %vm572_vm7, %vm573_vm2  ;;  %v667_v60 = vsel %vm572_vm7, %v526_v54, 0.0  ;;  %v431_v61 = vmul.f32 %v1589_v56, %v1877_v10  ;;  %v875_v24 = vrot.slane %v2204_v32, 1  ;;  %1655 = vmatpush3.bf16.msra.mxu1 %v1708_v42  ;;  %v1710_v54 = vld [vmem:[%s2570_s3 + $0x10] sm:$0xff]  }
  0x53   : > { %v797_v59 = vsel %vm689_vm1, %v792_v8, %v796_v51  ;;  %vm638_vm12 = vmand %vm572_vm7, %vm608_vm6  ;;  %v666_v6 = vsel %vm603_vm10, %v525_v53, 0.0  ;;  %v432_v0 = vmul.f32 %v1590_v57, %v1877_v10  ;;  %v433_v3 = vmul.f32 %v1877_v10, %v396_v58  ;;  %v1712_v58 = vld [vmem:[%s2570_s3 + $0x20] ss:$0 sps:$4 sm:$0xff]  }
  0x54   : > { %826 = vrot.lane.b32.xlu1 %v797_v59, %s1754_s16  ;;  %v668_v11 = vsel %vm638_vm12, %v527_v55, 0.0  ;;  %v2235_v1 = vpack.c.bf16 %v667_v60, %v666_v6  ;;  %v468_v12 = vadd.f32 %v1904_v21, %v431_v61  ;;  %vm2238_vm13 = vmand %vm543_vm8, %vm553_vm9  ;;  %v876_v5 = vrot.slane %v2206_v34, 1  ;;  %v1709_v34 = vld [vmem:[%s2570_s3 + $0x8] sm:$0xff]   ;;  %v1711_v55 = vld [vmem:[%s2570_s3 + $0x18] sm:$0xff]  }
  0x55   : > { %v688_v7 = vpack.c.bf16 %v668_v11, %v668_v11  ;;  %v469_v16 = vadd.f32 %v1904_v21, %v432_v0  ;;  %v470_v17 = vadd.f32 %v1904_v21, %v433_v3  ;;  %vm576_vm14 = vmand %vm2238_vm13, %vm573_vm2  ;;  %1626 = vmatprep.subr.bf16.mxu0 %v1709_v34  ;;  %1651 = vmatprep.subr.bf16.mxu1 %v1709_v34  ;;  %vm901_vm2 = vcmask 64512  }
  0x56   : > { %v799_v10 = vshrl.u32 %v2235_v1, 16  ;;  %v801_v18 = vshll.u32 %v2235_v1, 16  ;;  %v878_v19 = vrot.slane %v2235_v1, 1  ;;  %v498_v20 = vmax.f32 %v468_v12, 0.0  ;;  %vm611_vm15 = vmand %vm2238_vm13, %vm608_vm6  ;;  %1627 = vmatpush3.bf16.msra.mxu0 %v1709_v34  ;;  %1656 = vmatpush3.bf16.msra.mxu1 %v1709_v34 }
  0x57   : > { %v806_v22 = vshll.u32 %v688_v7, 16  ;;  %v879_v23 = vrot.slane %v688_v7, 1  ;;  %v499_v21 = vmax.f32 %v469_v16, 0.0  ;;  %v500_v63 = vmax.f32 %v470_v17, 0.0  ;;  %1628 = vmatprep.subr.bf16.mxu0 %v1710_v54  ;;  %1652 = vmatprep.subr.bf16.mxu1 %v1710_v54 }
  0x58   : > { %v803_v2 = vrot.slane %v801_v18, 1  ;;  %v639_v25 = vsel %vm576_vm14, %v498_v20, 0.0  ;;  %v877_v43 = vsel %vm850_vm11, %v875_v24, %v876_v5  ;;  %vm1078_vm6 = vcmask 1043456  }
  0x59   : > { %v808_v26 = vrot.slane %v806_v22, 1  ;;  %v880_v29 = vsel %vm850_vm11, %v878_v19, %v879_v23  ;;  %v640_v30 = vsel %vm2238_vm13, %v499_v21, 0.0  ;;  %v641_v9 = vsel %vm611_vm15, %v500_v63, 0.0 }
  0x5a   : > { %v804_v31 = vor.u32 %v803_v2, %v799_v10  ;;  %899 = vrot.lane.b32.xlu1 %v880_v29, %s1753_s25  ;;  %v2261_v35 = vpack.c.bf16 %v640_v30, %v639_v25  ;;  %v670_v28 = vpack.c.bf16 %v641_v9, %v641_v9  ;;  %1629 = vmatpush3.bf16.msra.mxu0 %v1710_v54  ;;  %v1080_v60 = vsel %vm1078_vm6, %v1712_v58, 0 }
  0x5b   : > { %1657 = vmatpush3.bf16.msra.mxu1 %v1710_v54  ;;  %1630 = vmatprep.subr.bf16.mxu0 %v1711_v55  ;;  %vm1001_vm0 = vcmask 392192   ;;  %vm1061_vm3 = vcmask 588800   ;;  %vm1243_vm4 = vcmask 60416   ;;  %vm1264_vm5 = vcmask (!%p1568_p8), 57344  }
  0x5c   : > { %v809_v36 = vsel %vm689_vm1, %v804_v31, %v808_v26  ;;  %v691_v37 = vshrl.u32 %v2261_v35, 16  ;;  %v693_v38 = vshll.u32 %v2261_v35, 16  ;;  %v698_v39 = vshll.u32 %v670_v28, 16  ;;  %1653 = vmatprep.subr.bf16.mxu1 %v1711_v55 }
  0x5d   : > { %828 = vrot.lane.b32.xlu0 %v809_v36, %s1754_s16  ;;  %v851_v40 = vrot.slane %v2261_v35, 1  ;;  %v852_v41 = vrot.slane %v670_v28, 1 }
  0x5e   : > { %v695_v44 = vrot.slane %v693_v38, 1  ;;  %v700_v45 = vrot.slane %v698_v39, 1  ;;  %1631 = vmatpush3.bf16.msra.mxu0 %v1711_v55 }
  0x5f   : > { %v853_v46 = vsel %vm850_vm11, %v851_v40, %v852_v41  ;;  %1658 = vmatpush3.bf16.msra.mxu1 %v1711_v55  ;;  %vm922_vm11 = vcmask 130048   ;;  %1660 = vmatprep.subr.msk.bf16.mxu0 %vm1078_vm6, %v1712_v58 }
  0x60   : > { %v696_v47 = vor.u32 %v695_v44, %v691_v37  ;;  %881 = vrot.lane.b32.xlu1 %v853_v46, %s1753_s25  ;;  %1661 = vmatprep.subr.msk.bf16.mxu1 %vm1078_vm6, %v1712_v58 }
  0x61   : > { %897 = vrot.lane.b32.xlu0 %v877_v43, %s1753_s25 }
  0x62   : > { %v701_v49 = vsel %vm689_vm1, %v696_v47, %v700_v45  ;;  %1633 = vmatpush3.bf16.msra.mxu0 %v1080_v60  ;;  %vm984_vm1 = vcmask 195584  }
  0x63   : > { %1659 = vmatpush3.bf16.msra.mxu1 %v1080_v60 }
  0x65   : > { %810 = vrot.lane.b32.xlu0 %v701_v49, %s1754_s16 }
  0x96   : > { %v892_v50 = vpop.permute.xlu1 %891 }
  0x97   : > { %v884_v51 = vpop.permute.xlu0 %883 }
  0x9c   : > { %v894_v52 = vpop.permute.xlu1 %893 }
  0xa4   : > { %v886_v53 = vpop.permute.xlu0 %885 }
  0xa7   : > { %v896_v8 = vpop.permute.xlu1 %895 }
  0xab   : > { %v815_v57 = vpop.permute.xlu1 %814 }
  0xac   : > { %v888_v56 = vpop.permute.xlu0 %887  ;;  %v907_v0 = vsel %vm901_vm2, %v2093_v13, %v815_v57 }
  0xad   : > { %v2299_v7 = vsel %vm922_vm11, %v907_v0, %v886_v53 }
  0xaf   : > { %v823_v3 = vpop.permute.xlu1 %822 }
  0xb0   : > { %v813_v59 = vpop.permute.xlu0 %812 }
  0xb1   : > { %v905_v61 = vsel %vm901_vm2, %v1995_v4, %v813_v59  ;;  %v915_v4 = vsel %vm901_vm2, %v2032_v33, %v823_v3 }
  0xb2   : > { %v926_v6 = vsel %vm922_vm11, %v905_v61, %v884_v51  ;;  %v2307_v16 = vsel %vm922_vm11, %v915_v4, %v894_v52  ;;  %v1538_v61 = vld [vmem:[%s2571_s4] ss:$0 sm:$0xff] }
  0xb3   : > { %951 = vrot.lane.b32.xlu0 %v926_v6, %s1755_s10  ;;  %v825_v33 = vpop.permute.xlu1 %824 }
  0xb4   : > { %v821_v11 = vpop.permute.xlu0 %820  ;;  %v917_v10 = vsel %vm901_vm2, %v2109_v27, %v825_v33 }
  0xb5   : > { %v913_v12 = vsel %vm901_vm2, %v1983_v62, %v821_v11 }
  0xb6   : > { %v934_v14 = vsel %vm922_vm11, %v913_v12, %v892_v50 }
  0xb7   : > { %959 = vrot.lane.b32.xlu1 %v934_v14, %s1755_s10  ;;  %953 = vrot.lane.b32.xlu0 %v2299_v7, %s1755_s10 }
  0xb8   : > { %v817_v13 = vpop.permute.xlu0 %816 }
  0xb9   : > { %v909_v62 = vsel %vm901_vm2, %v2133_v48, %v817_v13  ;;  %v2322_v48 = vsel %vm922_vm11, %v917_v10, %v896_v8 }
  0xba   : > { %v930_v17 = vsel %vm922_vm11, %v909_v62, %v888_v56 }
  0xbb   : > { %961 = vrot.lane.b32.xlu1 %v2307_v16, %s1755_s10  ;;  %968 = vrot.lane.b32.xlu0 %v2299_v7, %s1756_s15 }
  0xbf   : > { %976 = vrot.lane.b32.xlu1 %v2307_v16, %s1756_s15  ;;  %970 = vrot.lane.b32.xlu0 %v930_v17, %s1756_s15  ;;  %v890_v20 = vpop.permute.xlu1 %889 }
  0xc2   : > { %v819_v18 = vpop.permute.xlu0 %818 }
  0xc3   : > { %v911_v19 = vsel %vm901_vm2, %v2195_v15, %v819_v18  ;;  %978 = vrot.lane.b32.xlu1 %v2322_v48, %s1756_s15  ;;  %955 = vrot.lane.b32.xlu0 %v930_v17, %s1755_s10 }
  0xc4   : > { %v932_v27 = vsel %vm922_vm11, %v911_v19, %v890_v20 }
  0xc6   : > { %v827_v22 = vpop.permute.xlu1 %826 }
  0xc7   : > { %963 = vrot.lane.b32.xlu1 %v2322_v48, %s1755_s10  ;;  %957 = vrot.lane.b32.xlu0 %v932_v27, %s1755_s10  ;;  %v919_v15 = vsel %vm901_vm2, %v2204_v32, %v827_v22 }
  0xcb   : > { %972 = vrot.lane.b32.xlu0 %v932_v27, %s1756_s15 }
  0xcc   : > { %v900_v21 = vpop.permute.xlu1 %899 }
  0xcf   : > { %v829_v23 = vpop.permute.xlu0 %828  ;;  %974 = vrot.lane.b32.xlu0 %v934_v14, %s1756_s15 }
  0xd0   : > { %v921_v29 = vsel %vm901_vm2, %v2235_v1, %v829_v23 }
  0xd1   : > { %v942_v32 = vsel %vm922_vm11, %v921_v29, %v900_v21 }
  0xd2   : > { %v882_v24 = vpop.permute.xlu1 %881 }
  0xd3   : > { %v898_v63 = vpop.permute.xlu0 %897 }
  0xd4   : > { %v940_v2 = vsel %vm922_vm11, %v919_v15, %v898_v63 }
  0xd5   : > { %965 = vrot.lane.b32.xlu1 %v940_v2, %s1755_s10 }
  0xd7   : > { %v811_v25 = vpop.permute.xlu0 %810 }
  0xd8   : > { %v903_v26 = vsel %vm901_vm2, %v2261_v35, %v811_v25 }
  0xd9   : > { %980 = vrot.lane.b32.xlu1 %v940_v2, %s1756_s15  ;;  %v924_v30 = vsel %vm922_vm11, %v903_v26, %v882_v24 }
  0xdd   : > { %982 = vrot.lane.b32.xlu1 %v942_v32, %s1756_s15 }
 0x125   : > { %v952_v9 = vpop.permute.xlu0 %951 }
 0x126   : > { %v986_v28 = vsel %vm984_vm1, %v924_v30, %v952_v9 }
 0x129   : > { %v960_v31 = vpop.permute.xlu1 %959  ;;  %v954_v5 = vpop.permute.xlu0 %953 }
 0x12a   : > { %v994_v37 = vsel %vm984_vm1, %v932_v27, %v960_v31  ;;  %v988_v38 = vsel %vm984_vm1, %v926_v6, %v954_v5 }
 0x12d   : > { %v962_v35 = vpop.permute.xlu1 %961  ;;  %v969_v36 = vpop.permute.xlu0 %968 }
 0x12e   : > { %v1003_v1 = vsel %vm1001_vm0, %v986_v28, %v969_v36  ;;  %v996_v34 = vsel %vm984_vm1, %v934_v14, %v962_v35 }
 0x12f   : > { %1634 = vmatprep.mubr.msk.bf16.mxu0 %vm1061_vm3, %v1003_v1 }
 0x131   : > { %v977_v39 = vpop.permute.xlu1 %976  ;;  %v971_v40 = vpop.permute.xlu0 %970 }
 0x132   : > { %v1005_v41 = vsel %vm1001_vm0, %v988_v38, %v971_v40  ;;  %v1011_v42 = vsel %vm1001_vm0, %v994_v37, %v977_v39 }
 0x133   : > { %1635 = vmatmul.mubr.msk.bf16.vlgmr.msra.gmra.mrb[0].mxu0 %vm1061_vm3, %v1005_v41  ;;  %1642 = vmatprep.mubr.msk.bf16.mxu1 %vm1061_vm3, %v1011_v42 }
 0x135   : > { %v979_v43 = vpop.permute.xlu1 %978  ;;  %v956_v44 = vpop.permute.xlu0 %955 }
 0x136   : > { %v1013_v45 = vsel %vm1001_vm0, %v996_v34, %v979_v43  ;;  %v990_v47 = vsel %vm984_vm1, %v2299_v7, %v956_v44 }
 0x137   : > { %1643 = vmatmul.mubr.msk.bf16.vlgmr.msra.gmra.mrb[0].mxu1 %vm1061_vm3, %v1013_v45 }
 0x139   : > { %v958_v46 = vpop.permute.xlu0 %957  ;;  %v964_v51 = vpop.permute.xlu1 %963 }
 0x13a   : > { %v992_v52 = vsel %vm984_vm1, %v930_v17, %v958_v46  ;;  %v998_v55 = vsel %vm984_vm1, %v2307_v16, %v964_v51  ;;  %v1757_v46 = vmov (!%p1568_p8), 0.0  }
 0x13b   : > { %1265 = vst.msk [vmem:[%s1875_s8] sm:$0x1] (!%p1568_p8), %vm1264_vm5, %v1757_v46  ;;  %1266 = vst.msk [vmem:[%s1889_s14] sm:$0x1] (!%p1568_p8), %vm1264_vm5, %v1757_v46 }
 0x13d   : > { %v973_v49 = vpop.permute.xlu0 %972 }
 0x13e   : > { %v1007_v50 = vsel %vm1001_vm0, %v990_v47, %v973_v49 }
 0x13f   : > { %1638 = vmatprep.mubr.msk.bf16.mxu0 %vm1061_vm3, %v1007_v50 }
 0x141   : > { %v975_v53 = vpop.permute.xlu0 %974 }
 0x142   : > { %v1009_v54 = vsel %vm1001_vm0, %v992_v52, %v975_v53 }
 0x143   : > { %1639 = vmatmul.mubr.msk.bf16.gmra.mrb[4].mxu0 %vm1061_vm3, %v1009_v54 }
 0x147   : > { %v966_v8 = vpop.permute.xlu1 %965 }
 0x148   : > { %v1000_v58 = vsel %vm984_vm1, %v2322_v48, %v966_v8 }
 0x14b   : > { %v981_v56 = vpop.permute.xlu1 %980 }
 0x14c   : > { %v1015_v57 = vsel %vm1001_vm0, %v998_v55, %v981_v56 }
 0x14d   : > { %1646 = vmatprep.mubr.msk.bf16.mxu1 %vm1061_vm3, %v1015_v57 }
 0x14f   : > { %v983_v59 = vpop.permute.xlu1 %982 }
 0x150   : > { %v1017_v60 = vsel %vm1001_vm0, %v1000_v58, %v983_v59 }
 0x151   : > { %1647 = vmatmul.mubr.msk.bf16.gmra.mrb[4].mxu1 %vm1061_vm3, %v1017_v60 }
 0x206   : > { %v1636_v6 = vpop.f32.mrb[0].mxu0 }
 0x207   : > { %v2378_v0 = vadd.f32 %v1636_v6, %v1538_v61  ;;  %v1116_v3 = vpop.f32.mrb[1].mxu0 }
 0x208   : > { %v2385_v11 = vadd.f32 %v1538_v61, %v1116_v3  ;;  %v1637_v12 = vpop.f32.mrb[2].mxu0 }
 0x209   : > { %v1573_v14 = vpack.c.bf16 %v2378_v0, %v2378_v0  ;;  %v2389_v7 = vadd.f32 %v1637_v12, %v1538_v61  ;;  %v1119_v4 = vpop.f32.mrb[3].mxu0 }
 0x20a   : > { %v1571_v13 = vpack.c.bf16 %v2385_v11, %v2385_v11  ;;  %v2393_v16 = vadd.f32 %v1538_v61, %v1119_v4  ;;  %v1644_v62 = vpop.f32.mrb[0].mxu1 }
 0x20b   : > { %1246 = vst.msk [vmem:[%s2383_s20 + $0x8] sm:$0xf] %vm1243_vm4, %v1573_v14  ;;  %v1574_v33 = vpack.c.bf16 %v2389_v7, %v2389_v7  ;;  %v2399_v17 = vadd.f32 %v1644_v62, %v1538_v61  ;;  %v1148_v10 = vpop.f32.mrb[1].mxu1 }
 0x20c   : > { %1244 = vst.msk [vmem:[%s2383_s20] sm:$0xf] %vm1243_vm4, %v1571_v13  ;;  %v1572_v18 = vpack.c.bf16 %v2393_v16, %v2393_v16  ;;  %v2405_v48 = vadd.f32 %v1538_v61, %v1148_v10  ;;  %v1645_v19 = vpop.f32.mrb[2].mxu1 }
 0x20d   : > { %1247 = vst.msk [vmem:[%s2383_s20 + $0xc] sm:$0xf] %vm1243_vm4, %v1574_v33  ;;  %v1581_v20 = vpack.c.bf16 %v2399_v17, %v2399_v17  ;;  %v2411_v27 = vadd.f32 %v1645_v19, %v1538_v61  ;;  %v1151_v22 = vpop.f32.mrb[3].mxu1 }
 0x20e   : > { %1245 = vst.msk [vmem:[%s2383_s20 + $0x4] sm:$0xf] %vm1243_vm4, %v1572_v18  ;;  %v1579_v23 = vpack.c.bf16 %v2405_v48, %v2405_v48  ;;  %v2417_v15 = vadd.f32 %v1538_v61, %v1151_v22 }
 0x20f   : > { %1254 = vst.msk [vmem:[%s2383_s20 + $0x28] sm:$0xf] %vm1243_vm4, %v1581_v20  ;;  %v1582_v21 = vpack.c.bf16 %v2411_v27, %v2411_v27 }
 0x210   : > { %1252 = vst.msk [vmem:[%s2383_s20 + $0x20] sm:$0xf] %vm1243_vm4, %v1579_v23  ;;  %v1580_v63 = vpack.c.bf16 %v2417_v15, %v2417_v15 }
 0x211   : > { %1255 = vst.msk [vmem:[%s2383_s20 + $0x2c] sm:$0xf] %vm1243_vm4, %v1582_v21 }
 0x212   : > { %1253 = vst.msk [vmem:[%s2383_s20 + $0x24] sm:$0xf] %vm1243_vm4, %v1580_v63 }
 0x216   : > { %v1640_v2 = vpop.f32.mrb[4].mxu0 }
 0x217   : > { %v2431_v24 = vadd.f32 %v1640_v2, %v1538_v61  ;;  %v1132_v25 = vpop.f32.mrb[5].mxu0 }
 0x218   : > { %v1133_v26 = vadd.f32 %v1538_v61, %v1132_v25  ;;  %v1641_v29 = vpop.f32.mrb[6].mxu0 }
 0x219   : > { %v1577_v30 = vpack.c.bf16 %v2431_v24, %v2431_v24  ;;  %v2435_v32 = vadd.f32 %v1641_v29, %v1538_v61  ;;  %v1135_v9 = vpop.f32.mrb[7].mxu0 }
 0x21a   : > { %v1575_v31 = vpack.c.bf16 %v1133_v26, %v1133_v26  ;;  %v1136_v5 = vadd.f32 %v1538_v61, %v1135_v9 }
 0x21b   : > { %1250 = vst.msk [vmem:[%s2383_s20 + $0x18] sm:$0xf] %vm1243_vm4, %v1577_v30  ;;  %v1578_v28 = vpack.c.bf16 %v2435_v32, %v2435_v32 }
 0x21c   : > { %1248 = vst.msk [vmem:[%s2383_s20 + $0x10] sm:$0xf] %vm1243_vm4, %v1575_v31  ;;  %v1576_v35 = vpack.c.bf16 %v1136_v5, %v1136_v5 }
 0x21d   : > { %1251 = vst.msk [vmem:[%s2383_s20 + $0x1c] sm:$0xf] %vm1243_vm4, %v1578_v28 }
 0x21e   : > { %1249 = vst.msk [vmem:[%s2383_s20 + $0x14] sm:$0xf] %vm1243_vm4, %v1576_v35 }
 0x224   : > { %v1648_v36 = vpop.f32.mrb[4].mxu1 }
 0x225   : > { %v2447_v1 = vadd.f32 %v1648_v36, %v1538_v61  ;;  %v1164_v37 = vpop.f32.mrb[5].mxu1 }
 0x226   : > { %v2449_v38 = vadd.f32 %v1538_v61, %v1164_v37  ;;  %v1649_v39 = vpop.f32.mrb[6].mxu1  ;;  %1263 = sbr.rel (%p1568_p8) target bundleno = 557 (0x22d), region = 44 }
 0x227   : > { %v1585_v40 = vpack.c.bf16 %v2447_v1, %v2447_v1  ;;  %v2453_v41 = vadd.f32 %v1649_v39, %v1538_v61  ;;  %v1167_v42 = vpop.f32.mrb[7].mxu1 }
 0x228   : > { %v1583_v34 = vpack.c.bf16 %v2449_v38, %v2449_v38  ;;  %v2457_v43 = vadd.f32 %v1538_v61, %v1167_v42 }
 0x229   : > { %1258 = vst.msk [vmem:[%s2383_s20 + $0x38] sm:$0xf] %vm1243_vm4, %v1585_v40  ;;  %v1586_v44 = vpack.c.bf16 %v2453_v41, %v2453_v41 }
 0x22a   : > { %1256 = vst.msk [vmem:[%s2383_s20 + $0x30] sm:$0xf] %vm1243_vm4, %v1583_v34  ;;  %v1584_v45 = vpack.c.bf16 %v2457_v43, %v2457_v43 }
 0x22b   : > { %1259 = vst.msk [vmem:[%s2383_s20 + $0x3c] sm:$0xf] %vm1243_vm4, %v1586_v44 }
 0x22c   : > { %1257 = vst.msk [vmem:[%s2383_s20 + $0x34] sm:$0xf] %vm1243_vm4, %v1584_v45 }
 0x22d PF: > { %v1268_v47 = vsel %vm901_vm2, %v2385_v11, 0.0  ;;  %v1269_v49 = vsel %vm901_vm2, %v2393_v16, 0.0  ;;  %v1271_v50 = vsel %vm901_vm2, %v2378_v0, 0.0  ;;  %v1273_v52 = vsel %vm901_vm2, %v2389_v7, 0.0 }
 0x22e   : > { %v1270_v51 = vadd.f32 %v1269_v49, %v1268_v47  ;;  %v1275_v54 = vsel %vm901_vm2, %v1133_v26, 0.0  ;;  %v1309_v55 = vmul.f32 %v2385_v11, %v2385_v11  ;;  %v1310_v56 = vmul.f32 %v2393_v16, %v2393_v16 }
 0x22f   : > { %v1277_v57 = vsel %vm901_vm2, %v1136_v5, 0.0  ;;  %v1311_v58 = vmul.f32 %v2378_v0, %v2378_v0  ;;  %v1312_v60 = vmul.f32 %v2389_v7, %v2389_v7  ;;  %v1279_v61 = vsel %vm901_vm2, %v2431_v24, 0.0 }
 0x230   : > { %v1272_v53 = vadd.f32 %v1271_v50, %v1270_v51  ;;  %v1313_v3 = vmul.f32 %v1133_v26, %v1133_v26  ;;  %v1325_v12 = vsel %vm901_vm2, %v1309_v55, 0.0  ;;  %v1326_v11 = vsel %vm901_vm2, %v1310_v56, 0.0 }
 0x231   : > { %v1281_v14 = vsel %vm901_vm2, %v2435_v32, 0.0  ;;  %v1327_v4 = vadd.f32 %v1326_v11, %v1325_v12  ;;  %v1328_v13 = vsel %vm901_vm2, %v1311_v58, 0.0  ;;  %v1314_v16 = vmul.f32 %v1136_v5, %v1136_v5 }
 0x232   : > { %v1274_v8 = vadd.f32 %v1273_v52, %v1272_v53  ;;  %v1330_v62 = vsel %vm901_vm2, %v1312_v60, 0.0  ;;  %v1283_v7 = vsel %vm901_vm2, %v2405_v48, 0.0  ;;  %v1315_v18 = vmul.f32 %v2431_v24, %v2431_v24 }
 0x233   : > { %v1329_v33 = vadd.f32 %v1328_v13, %v1327_v4  ;;  %v1332_v19 = vsel %vm901_vm2, %v1313_v3, 0.0  ;;  %v1285_v20 = vsel %vm901_vm2, %v2417_v15, 0.0  ;;  %v1316_v21 = vmul.f32 %v2435_v32, %v2435_v32  ;;  %v1267_v4 = vld [vmem:[%s1875_s8] sm:$0x1] }
 0x234   : > { %v1276_v59 = vadd.f32 %v1275_v54, %v1274_v8  ;;  %v1334_v63 = vsel %vm901_vm2, %v1314_v16, 0.0  ;;  %v1287_v2 = vsel %vm901_vm2, %v2399_v17, 0.0  ;;  %v1317_v24 = vmul.f32 %v2405_v48, %v2405_v48 }
 0x235   : > { %v1331_v22 = vadd.f32 %v1330_v62, %v1329_v33  ;;  %v1336_v29 = vsel %vm901_vm2, %v1315_v18, 0.0  ;;  %v1289_v30 = vsel %vm901_vm2, %v2411_v27, 0.0  ;;  %v1318_v32 = vmul.f32 %v2417_v15, %v2417_v15 }
 0x236   : > { %v1278_v6 = vadd.f32 %v1277_v57, %v1276_v59  ;;  %v1338_v5 = vsel %vm901_vm2, %v1316_v21, 0.0  ;;  %v1291_v28 = vsel %vm901_vm2, %v2449_v38, 0.0  ;;  %v1319_v48 = vmul.f32 %v2399_v17, %v2399_v17 }
 0x237   : > { %v1333_v25 = vadd.f32 %v1332_v19, %v1331_v22  ;;  %v1340_v37 = vsel %vm901_vm2, %v1317_v24, 0.0  ;;  %v1293_v39 = vsel %vm901_vm2, %v2457_v43, 0.0  ;;  %v1320_v15 = vmul.f32 %v2411_v27, %v2411_v27 }
 0x238   : > { %v1280_v0 = vadd.f32 %v1279_v61, %v1278_v6  ;;  %v1342_v34 = vsel %vm901_vm2, %v1318_v32, 0.0  ;;  %v1295_v44 = vsel %vm901_vm2, %v2447_v1, 0.0  ;;  %v1321_v17 = vmul.f32 %v2449_v38, %v2449_v38 }
 0x239   : > { %v1335_v9 = vadd.f32 %v1334_v63, %v1333_v25  ;;  %v1344_v47 = vsel %vm901_vm2, %v1319_v48, 0.0  ;;  %v1297_v49 = vsel %vm901_vm2, %v2453_v41, 0.0  ;;  %v1322_v27 = vmul.f32 %v2457_v43, %v2457_v43 }
 0x23a   : > { %v1282_v10 = vadd.f32 %v1281_v14, %v1280_v0  ;;  %v1346_v52 = vsel %vm901_vm2, %v1320_v15, 0.0  ;;  %v1323_v8 = vmul.f32 %v2447_v1, %v2447_v1  ;;  %v1348_v38 = vsel %vm901_vm2, %v1321_v17, 0.0 }
 0x23b   : > { %v1337_v35 = vadd.f32 %v1336_v29, %v1335_v9  ;;  %v1324_v57 = vmul.f32 %v2453_v41, %v2453_v41  ;;  %v1350_v58 = vsel %vm901_vm2, %v1322_v27, 0.0  ;;  %vm1306_vm7 = vcmask 57344  }
 0x23c   : > { %v1284_v23 = vadd.f32 %v1283_v7, %v1282_v10  ;;  %v1352_v43 = vsel %vm901_vm2, %v1323_v8, 0.0  ;;  %v1308_v10 = vld [vmem:[%s1889_s14] sm:$0x1] }
 0x23d   : > { %v1339_v40 = vadd.f32 %v1338_v5, %v1337_v35  ;;  %v1354_v1 = vsel %vm901_vm2, %v1324_v57, 0.0 }
 0x23e   : > { %v1286_v26 = vadd.f32 %v1285_v20, %v1284_v23 }
 0x23f   : > { %v1341_v45 = vadd.f32 %v1340_v37, %v1339_v40 }
 0x240   : > { %v1288_v31 = vadd.f32 %v1287_v2, %v1286_v26 }
 0x241   : > { %v1343_v50 = vadd.f32 %v1342_v34, %v1341_v45 }
 0x242   : > { %v1290_v36 = vadd.f32 %v1289_v30, %v1288_v31 }
 0x243   : > { %v1345_v53 = vadd.f32 %v1344_v47, %v1343_v50 }
 0x244   : > { %v1292_v42 = vadd.f32 %v1291_v28, %v1290_v36 }
 0x245   : > { %v1347_v55 = vadd.f32 %v1346_v52, %v1345_v53 }
 0x246   : > { %v1294_v46 = vadd.f32 %v1293_v39, %v1292_v42 }
 0x247   : > { %v1349_v59 = vadd.f32 %v1348_v38, %v1347_v55 }
 0x248   : > { %v1296_v51 = vadd.f32 %v1295_v44, %v1294_v46 }
 0x249   : > { %v1351_v61 = vadd.f32 %v1350_v58, %v1349_v59 }
 0x24a   : > { %v1298_v54 = vadd.f32 %v1297_v49, %v1296_v51 }
 0x24b   : > { %v1353_v3 = vadd.f32 %v1352_v43, %v1351_v61 }
 0x24c   : > { %v1299_v56 = vrot.slane %v1298_v54, 4 }
 0x24d   : > { %v1355_v11 = vadd.f32 %v1354_v1, %v1353_v3 }
 0x24e   : > { %v1300_v60 = vadd.f32 %v1299_v56, %v1298_v54 }
 0x24f   : > { %v1356_v13 = vrot.slane %v1355_v11, 4 }
 0x250   : > { %v1301_v6 = vrot.slane %v1300_v60, 2 }
 0x251   : > { %v1357_v0 = vadd.f32 %v1356_v13, %v1355_v11 }
 0x252   : > { %v1302_v12 = vadd.f32 %v1301_v6, %v1300_v60 }
 0x253   : > { %v1358_v62 = vrot.slane %v1357_v0, 2 }
 0x254   : > { %v1303_v14 = vrot.slane %v1302_v12, 1 }
 0x255   : > { %v1359_v7 = vadd.f32 %v1358_v62, %v1357_v0 }
 0x256   : > { %v1304_v41 = vadd.f32 %v1303_v14, %v1302_v12 }
 0x257   : > { %v1360_v33 = vrot.slane %v1359_v7, 1 }
 0x258   : > { %v1305_v16 = vadd.f32 %v1304_v41, %v1267_v4 }
 0x259   : > { %v1361_v18 = vadd.f32 %v1360_v33, %v1359_v7 }
 0x25a   : > { %1307 = vst.msk [vmem:[%s1875_s8] sm:$0x1] %vm1306_vm7, %v1305_v16 }
 0x25b   : > { %v1362_v19 = vadd.f32 %v1361_v18, %v1308_v10 }
 0x25d   : > { %1363 = vst.msk [vmem:[%s1889_s14] sm:$0x1] %vm1306_vm7, %v1362_v19 }
 0x25e PF: > { %s18_s28 = sadd.s32 1, %s1751_s28   ;;  %s2605_s24 = smov %s1743_s26 }
 0x25f   : > { %p15_p9 = scmp.ge.s32.totalorder %s18_s28, 6   ;;  %s2606_s25 = smov %s1747_s27 }
 0x260   : > { %s2607_s26 = smov %s2610_s29  ;;  %s2608_s27 = smov %s2614_s30 }
 0x261   :  { %17 = sbr.rel (!%p15_p9) target bundleno = 3 (0x3), region = 104 }

</bundles_post_ra>
